<compile_context>
chip_gen: v7x
topology: tpu7x:2x2x1
jax: 0.10.0
libtpu: 0.0.40
codegen_flags: <defaults>
</compile_context>

<pallas_src>
from functools import partial

import numpy as np
import jax
import jax.numpy as jnp
from jax.experimental import pallas as pl
from jax.experimental.pallas import tpu as pltpu

F32 = jnp.float32
BF16 = jnp.bfloat16


# ----------------------------------------------------------------------------
# Single fused Pallas kernel: VAE encode + add_noise + DDIM inversion + CFG grad
# ----------------------------------------------------------------------------

def _make_ism_kernel(max_steps):
    def kernel(coef_ref, x_ref, wvae_ref, n1_ref, n2_ref, ctx_inv_ref,
               ctx_u_ref, ctx_t_ref, smat_ref, grad_ref, lat_sc, tgt_sc):
        # --- VAE-encode proxy: latents = 0.18215 * W @ (pred_rgb*2 - 1) -----
        xb = (x_ref[...] * 2.0 - 1.0).astype(BF16)
        lat0 = 0.18215 * jnp.dot(wvae_ref[...], xb,
                                 preferred_element_type=jnp.float32)
        # noise = randn(B,4,h,w) + 0.1 * per-channel randn offset (folded)
        noise = n1_ref[...] + 0.1 * n2_ref[...]
        # scheduler.add_noise(latents, noise, timesteps[starting_ind])
        lat_sc[...] = coef_ref[0] * lat0 + coef_ref[1] * noise
        tgt_sc[...] = jnp.zeros_like(tgt_sc)

        smat = smat_ref[...]
        ctx_inv = ctx_inv_ref[...]

        # --- DDIM inversion (xs loop + xt step), statically unrolled --------
        for s in range(max_steps):
            base = 2 + 6 * s

            @pl.when(coef_ref[base + 5] > 0.5)      # skip padded no-op steps
            def _(base=base):
                ts = coef_ref[base + 0]       # cos(pi*t_cur/T) timestep mod
                inv_sac = coef_ref[base + 1]  # 1/sqrt(alpha_bar[t_cur])
                s_1ac = coef_ref[base + 2]    # sqrt(1 - alpha_bar[t_cur])
                s_an = coef_ref[base + 3]     # sqrt(alpha_bar[t_next])
                s_1an = coef_ref[base + 4]    # sqrt(1 - alpha_bar[t_next])
                lat = lat_sc[...]
                mix = jnp.dot(lat.astype(BF16), smat,
                              preferred_element_type=jnp.float32)
                eps = jnp.tanh(mix * ts + ctx_inv)      # UNet proxy
                x0 = (lat - s_1ac * eps) * inv_sac      # multiply, not divide
                lat_sc[...] = s_an * x0 + s_1an * eps   # DDIM (eta = 0)
                tgt_sc[...] = eps                       # last active = target

        # --- final UNet pass + CFG combine + ISM grad ------------------------
        fb = 2 + 6 * max_steps
        ts_f = coef_ref[fb + 0]
        scale = coef_ref[fb + 1]          # grad_scale * w(alpha_t)
        guidance = coef_ref[fb + 2]       # CFG guidance (1.0 in ISMLoss)
        lat = lat_sc[...]                 # latents_noisy
        mix = jnp.dot(lat.astype(BF16), smat,
                      preferred_element_type=jnp.float32) * ts_f
        eps_u = jnp.tanh(mix + ctx_u_ref[...])
        eps_t = jnp.tanh(mix + ctx_t_ref[...])
        pred_noise = eps_u + guidance * (eps_t - eps_u)
        g = scale * (pred_noise - tgt_sc[...])
        g = jnp.where(jnp.isnan(g), 0.0, g)             # nan_to_num
        big = jnp.finfo(jnp.float32).max
        grad_ref[...] = jnp.clip(g, -big, big)

    return kernel


def ism_fused_forward(coefs, x_patch, w_vae_t, n1, n2, ctx_inv, ctx_u, ctx_t,
                      smat, *, max_steps):
    n_lanes = x_patch.shape[1]            # B * HW (lane-dense, multiple of 128)
    vmem = pl.BlockSpec(memory_space=pltpu.MemorySpace.VMEM)
    # TODO(synk): at real SD latent sizes (HW >= 4096) smat must be K/N-tiled
    # over an extra "arbitrary" grid axis (Buffered(1) for invariant inputs),
    # vmem_limit_bytes raised past the scoped default, and a batch-parallel
    # leading axis added to use v7x's second TensorCore.
    return pl.pallas_call(
        _make_ism_kernel(max_steps),
        out_shape=jax.ShapeDtypeStruct((4, n_lanes), F32),
        in_specs=[
            pl.BlockSpec(memory_space=pltpu.MemorySpace.SMEM),   # coef table
            vmem,   # x_patch   (192, B*HW) f32
            vmem,   # w_vae_t   (4, 192)    bf16
            vmem,   # n1        (4, B*HW)   f32
            vmem,   # n2        (4, 1)      f32
            vmem,   # ctx_inv   (1, B*HW)   f32
            vmem,   # ctx_u     (1, B*HW)   f32
            vmem,   # ctx_t     (1, B*HW)   f32
            vmem,   # smat      (B*HW, B*HW) bf16 block-diagonal
        ],
        out_specs=vmem,
        scratch_shapes=[pltpu.VMEM((4, n_lanes), F32),   # running latent
                        pltpu.VMEM((4, n_lanes), F32)],  # target eps
    )(coefs, x_patch, w_vae_t, n1, n2, ctx_inv, ctx_u, ctx_t, smat)


# ----------------------------------------------------------------------------
# Jitted forward (all device work behind one jit; one Pallas launch total)
# ----------------------------------------------------------------------------

@partial(jax.jit, static_argnames=("max_steps",))
def _ism_forward(params, pred_rgb, prompt_key, noise_key, coefs, *, max_steps):
    w_vae_t = params["w_vae_t"]              # (4, 192) bf16
    smat = params["smat"]                    # (B*HW, B*HW) bf16 block-diag
    pmat = params["pmat"]                    # (D, HW) f32
    uncond_emb = params["uncond_emb"]        # (B, S, D)
    emb_inv_empty = params["emb_inv_empty"]  # (S, D)  '' prompt inverse emb

    B, C, H, W = pred_rgb.shape
    h, w = H // 8, W // 8
    HW = h * w

    # Patchify pred_rgb into a lane-dense (C*64, B*HW) slab (layout plumbing).
    x = pred_rgb.reshape(B, C, h, 8, w, 8)
    x = jnp.transpose(x, (1, 3, 5, 0, 2, 4)).reshape(C * 64, B * HW)

    # noise = randn(B,4,h,w) + 0.1 * randn(1,4,1,1)  (combine happens in-kernel)
    k1, k2 = jax.random.split(noise_key)
    n1 = jax.random.normal(k1, (4, B * HW), F32)
    n2 = jax.random.normal(k2, (4, 1), F32)

    # TODO(synk): tokenizer + CLIP text encoder are untranslatable; synthetic
    # embeddings with the same (batch, seq, dim) layout stand in for them.
    text_emb = jax.random.normal(prompt_key, uncond_emb.shape, F32) * 0.02

    # Hoisted UNet-proxy context projections (invariant across inversion steps).
    ctx_inv = jnp.dot(jnp.mean(emb_inv_empty, axis=0), pmat)          # (HW,)
    ctx_inv = jnp.broadcast_to(ctx_inv[None, :], (B, HW)).reshape(1, B * HW)
    ctx_u = jnp.dot(jnp.mean(uncond_emb, axis=1), pmat).reshape(1, B * HW)
    ctx_t = jnp.dot(jnp.mean(text_emb, axis=1), pmat).reshape(1, B * HW)

    grad = ism_fused_forward(coefs, x, w_vae_t, n1, n2, ctx_inv, ctx_u, ctx_t,
                             smat, max_steps=max_steps)
    grad = jnp.transpose(grad.reshape(4, B, h, w), (1, 0, 2, 3))      # NCHW

    # SpecifyGradient.forward returns ones([1]); grad is what its backward emits.
    # TODO(synk): the custom autograd backward has no forward-pass equivalent.
    loss = jnp.ones((1,), dtype=F32)
    return loss, grad


# ----------------------------------------------------------------------------
# ISMLoss (forward-pass semantics) on top of the fused Pallas kernel
# ----------------------------------------------------------------------------

class ISMLossPallas:
    def __init__(self, key, B, seq_len=8, emb_dim=32, resolution=(64, 64),
                 t_range=(0.02, 0.98), max_t_range=0.98, num_train_timesteps=50):
        self.T = num_train_timesteps
        # DDIM / SD "scaled_linear" beta schedule -> alphas_cumprod
        betas = np.linspace(0.00085 ** 0.5, 0.012 ** 0.5, self.T, dtype=np.float64) ** 2
        self.alphas = np.cumprod(1.0 - betas)
        self.timesteps = np.arange(self.T)                       # flipped (ascending)
        self.min_step = int(self.T * t_range[0])
        self.max_step = int(self.T * t_range[1])
        self.warmup_step = int(self.T * (max_t_range - t_range[1]))
        self.delta_t = 35
        self.xs_delta_t = 200
        self.xs_inv_steps = 5
        self.xs_eta = 0.0
        self.denoise_guidance_scale = 1.0
        self.max_steps = self.xs_inv_steps + 1                   # xs loop + xt step
        self.resolution = resolution
        self.B, self.S, self.D = B, seq_len, emb_dim
        self.HW = (resolution[0] // 8) * (resolution[1] // 8)
        self._np_rng = np.random.default_rng(256)                # noise_gen seed 256

        ks = jax.random.split(key, 8)
        # deterministic synthetic parameters (stand-ins for pretrained weights)
        w_vae = jax.random.normal(ks[0], (3 * 8 * 8, 4), F32) * 0.05
        smat_s = jax.random.normal(ks[1], (self.HW, self.HW), F32) / np.sqrt(self.HW)
        # Block-diagonal over batch: the UNet-proxy spatial mixing becomes one
        # lane-dense (4, B*HW) @ (B*HW, B*HW) MXU pass, per-sample mixing kept.
        smat = jnp.kron(jnp.eye(B, dtype=F32), smat_s)
        pmat = jax.random.normal(ks[2], (emb_dim, self.HW), F32) * 0.1
        # embedding_inverse = cat([negative-prompt embedding, '' embedding])
        neg = jax.random.normal(ks[3], (1, seq_len, emb_dim), F32) * 0.02
        empty = jax.random.normal(ks[4], (1, seq_len, emb_dim), F32) * 0.02
        self.embedding_inverse = jnp.concatenate([neg, empty], axis=0)   # (2, S, D)
        uncond_emb = jax.random.normal(ks[5], (B, seq_len, emb_dim), F32) * 0.02
        self.params = {
            "w_vae_t": jnp.transpose(w_vae).astype(BF16),   # (4, 192) bf16
            "smat": smat.astype(BF16),                      # (B*HW, B*HW) bf16
            "pmat": pmat,
            "uncond_emb": uncond_emb,
            "emb_inv_empty": self.embedding_inverse[1],
        }
        # advanced every forward (mirrors the torch generator state advancing)
        self._noise_key = ks[6]

    # Host-side schedule builder: mirrors add_noise_with_cfg index logic and
    # packs per-step coefficients into one fixed-shape 1-D table (front-padded
    # with inactive steps that the kernel skips), so jit never retraces.
    def _build_schedule(self, ind_t, grad_scale):
        T, ts_arr, alphas = self.T, self.timesteps, self.alphas
        ind_prev_t = max(ind_t - self.delta_t, 0)
        starting_ind = max(ind_prev_t - self.xs_delta_t * self.xs_inv_steps, 0)

        def step_coefs(cur_ind, next_ind):
            t_cur, t_nxt = int(ts_arr[cur_ind]), int(ts_arr[next_ind])
            a_c, a_n = float(alphas[t_cur]), float(alphas[t_nxt])
            return (np.cos(np.pi * t_cur / T),
                    1.0 / np.sqrt(a_c), np.sqrt(1.0 - a_c),
                    np.sqrt(a_n), np.sqrt(1.0 - a_n), 1.0)

        steps = []
        cur = starting_ind                       # xs pass: starting_ind -> ind_prev_t
        for _ in range(self.xs_inv_steps):
            nxt = min(cur + self.xs_delta_t, ind_prev_t)
            steps.append(step_coefs(cur, nxt))
            cur = nxt
            if cur == ind_prev_t:
                break
        # xt pass: single step ind_prev_t -> ind_t (is_noisy_latent=True)
        steps.append(step_coefs(ind_prev_t, min(ind_prev_t + self.delta_t, ind_t)))

        pad = [(1.0, 1.0, 0.0, 1.0, 0.0, 0.0)] * (self.max_steps - len(steps))
        steps = pad + steps                      # padded steps skipped via pl.when

        a_start = float(alphas[int(ts_arr[starting_ind])])
        t = int(ts_arr[ind_t])
        a_t = float(alphas[t])
        w_t = float(np.sqrt((1.0 - a_t) / a_t))

        coefs = np.empty(2 + self.max_steps * 6 + 3, np.float32)
        coefs[0], coefs[1] = np.sqrt(a_start), np.sqrt(1.0 - a_start)
        coefs[2:2 + self.max_steps * 6] = np.asarray(steps, np.float32).reshape(-1)
        coefs[-3:] = (np.cos(np.pi * t / T), grad_scale * w_t, 1.0)
        return coefs

    def forward(self, prompt_key, pred_rgb, grad_scale=1.0):
        ind_t = int(self._np_rng.integers(self.min_step, self.max_step))
        coefs = self._build_schedule(ind_t, grad_scale)
        self._noise_key, nk = jax.random.split(self._noise_key)
        return _ism_forward(self.params, pred_rgb, prompt_key, nk,
                            jnp.asarray(coefs), max_steps=self.max_steps)


if __name__ == "__main__":
    key = jax.random.PRNGKey(0)
    k_init, k_rgb, k_prompt = jax.random.split(key, 3)
    B = 2
    resolution = (64, 64)   # -> 8x8 latents, HW = 64, B*HW = 128 (lane-dense)
    loss_mod = ISMLossPallas(k_init, B=B, seq_len=8, emb_dim=32, resolution=resolution)
    pred_rgb = jax.random.uniform(k_rgb, (B, 3, resolution[0], resolution[1]), F32)
    loss, grad = loss_mod.forward(k_prompt, pred_rgb, grad_scale=1.0)
    jax.block_until_ready((loss, grad))
    assert loss.shape == (1,) and grad.shape == (B, 4, resolution[0] // 8, resolution[1] // 8)
    assert bool(jnp.all(jnp.isfinite(grad)))
    print("KERNEL_OK")
</pallas_src>

<mosaic_0001>
module attributes {stable_mosaic.version = 11 : i64} {
  func.func @kernel(%arg0: memref<41xf32, #tpu.memory_space<smem>>, %arg1: memref<192x128xf32, #tpu.memory_space<vmem>>, %arg2: memref<4x192xbf16, #tpu.memory_space<vmem>>, %arg3: memref<4x128xf32, #tpu.memory_space<vmem>>, %arg4: memref<4x1xf32, #tpu.memory_space<vmem>>, %arg5: memref<1x128xf32, #tpu.memory_space<vmem>>, %arg6: memref<1x128xf32, #tpu.memory_space<vmem>>, %arg7: memref<1x128xf32, #tpu.memory_space<vmem>>, %arg8: memref<128x128xbf16, #tpu.memory_space<vmem>>, %arg9: memref<4x128xf32, #tpu.memory_space<vmem>>, %arg10: memref<4x128xf32, #tpu.memory_space<vmem>>, %arg11: memref<4x128xf32, #tpu.memory_space<vmem>>) attributes {dimension_semantics = [], scalar_prefetch = 0 : i64, scratch_operands = 2 : i64, tpu.core_type = #tpu.core_type<tc>} {
    %c0 = arith.constant 0 : index
    %c0_0 = arith.constant 0 : index
    %0 = vector.load %arg1[%c0, %c0_0] : memref<192x128xf32, #tpu.memory_space<vmem>>, vector<192x128xf32>
    %cst = arith.constant 2.000000e+00 : f32
    %1 = vector.broadcast %cst : f32 to vector<192x128xf32>
    %2 = arith.mulf %0, %1 : vector<192x128xf32>
    %cst_1 = arith.constant 1.000000e+00 : f32
    %3 = vector.broadcast %cst_1 : f32 to vector<192x128xf32>
    %4 = arith.subf %2, %3 : vector<192x128xf32>
    %5 = arith.truncf %4 : vector<192x128xf32> to vector<192x128xbf16>
    %c0_2 = arith.constant 0 : index
    %c0_3 = arith.constant 0 : index
    %6 = vector.load %arg2[%c0_2, %c0_3] : memref<4x192xbf16, #tpu.memory_space<vmem>>, vector<4x192xbf16>
    %cst_4 = arith.constant dense<0.000000e+00> : vector<4x128xf32>
    %7 = tpu.matmul %6, %5, %cst_4 {dimension_numbers = #tpu.dot_dimension_numbers<[1], [0], [0], [1], [0, 0, 1, 1], [], []>} : vector<4x192xbf16>, vector<192x128xbf16>, vector<4x128xf32> -> vector<4x128xf32>
    %cst_5 = arith.constant 1.821500e-01 : f32
    %8 = vector.broadcast %cst_5 : f32 to vector<4x128xf32>
    %9 = arith.mulf %8, %7 : vector<4x128xf32>
    %c0_6 = arith.constant 0 : index
    %c0_7 = arith.constant 0 : index
    %10 = vector.load %arg3[%c0_6, %c0_7] : memref<4x128xf32, #tpu.memory_space<vmem>>, vector<4x128xf32>
    %c0_8 = arith.constant 0 : index
    %c0_9 = arith.constant 0 : index
    %11 = vector.load %arg4[%c0_8, %c0_9] : memref<4x1xf32, #tpu.memory_space<vmem>>, vector<4x1xf32>
    %cst_10 = arith.constant 1.000000e-01 : f32
    %12 = vector.broadcast %cst_10 : f32 to vector<4x1xf32>
    %13 = arith.mulf %12, %11 : vector<4x1xf32>
    %14 = vector.broadcast %13 : vector<4x1xf32> to vector<4x128xf32>
    %15 = arith.addf %10, %14 : vector<4x128xf32>
    %c0_11 = arith.constant 0 : index
    %16 = memref.load %arg0[%c0_11] : memref<41xf32, #tpu.memory_space<smem>>
    %17 = vector.broadcast %16 : f32 to vector<4x128xf32>
    %18 = arith.mulf %17, %9 : vector<4x128xf32>
    %c1 = arith.constant 1 : index
    %19 = memref.load %arg0[%c1] : memref<41xf32, #tpu.memory_space<smem>>
    %20 = vector.broadcast %19 : f32 to vector<4x128xf32>
    %21 = arith.mulf %20, %15 : vector<4x128xf32>
    %22 = arith.addf %18, %21 : vector<4x128xf32>
    %c0_12 = arith.constant 0 : index
    %c0_13 = arith.constant 0 : index
    %23 = vector.load %arg10[%c0_12, %c0_13] : memref<4x128xf32, #tpu.memory_space<vmem>>, vector<4x128xf32>
    tpu.vector_store %arg10[%c0_12, %c0_13], %22 {strides = array<i32>} : memref<4x128xf32, #tpu.memory_space<vmem>>, vector<4x128xf32>,
    %cst_14 = arith.constant 0.000000e+00 : f32
    %24 = vector.broadcast %cst_14 : f32 to vector<4x128xf32>
    %c0_15 = arith.constant 0 : index
    %c0_16 = arith.constant 0 : index
    %25 = vector.load %arg11[%c0_15, %c0_16] : memref<4x128xf32, #tpu.memory_space<vmem>>, vector<4x128xf32>
    tpu.vector_store %arg11[%c0_15, %c0_16], %24 {strides = array<i32>} : memref<4x128xf32, #tpu.memory_space<vmem>>, vector<4x128xf32>,
    %c0_17 = arith.constant 0 : index
    %c0_18 = arith.constant 0 : index
    %26 = vector.load %arg8[%c0_17, %c0_18] : memref<128x128xbf16, #tpu.memory_space<vmem>>, vector<128x128xbf16>
    %c0_19 = arith.constant 0 : index
    %c0_20 = arith.constant 0 : index
    %27 = vector.load %arg5[%c0_19, %c0_20] : memref<1x128xf32, #tpu.memory_space<vmem>>, vector<1x128xf32>
    %c7 = arith.constant 7 : index
    %28 = memref.load %arg0[%c7] : memref<41xf32, #tpu.memory_space<smem>>
    %cst_21 = arith.constant 5.000000e-01 : f32
    %29 = arith.cmpf ogt, %28, %cst_21 : f32
    %30 = arith.extui %29 : i1 to i32
    %c0_i32 = arith.constant 0 : i32
    %31 = arith.cmpi ne, %30, %c0_i32 : i32
    scf.if %31 {
      %c2 = arith.constant 2 : index
      %84 = memref.load %arg0[%c2] : memref<41xf32, #tpu.memory_space<smem>>
      %c3 = arith.constant 3 : index
      %85 = memref.load %arg0[%c3] : memref<41xf32, #tpu.memory_space<smem>>
      %c4 = arith.constant 4 : index
      %86 = memref.load %arg0[%c4] : memref<41xf32, #tpu.memory_space<smem>>
      %c5 = arith.constant 5 : index
      %87 = memref.load %arg0[%c5] : memref<41xf32, #tpu.memory_space<smem>>
      %c6 = arith.constant 6 : index
      %88 = memref.load %arg0[%c6] : memref<41xf32, #tpu.memory_space<smem>>
      %c0_46 = arith.constant 0 : index
      %c0_47 = arith.constant 0 : index
      %89 = vector.load %arg10[%c0_46, %c0_47] : memref<4x128xf32, #tpu.memory_space<vmem>>, vector<4x128xf32>
      %90 = arith.truncf %89 : vector<4x128xf32> to vector<4x128xbf16>
      %cst_48 = arith.constant dense<0.000000e+00> : vector<4x128xf32>
      %91 = tpu.matmul %90, %26, %cst_48 {dimension_numbers = #tpu.dot_dimension_numbers<[1], [0], [0], [1], [0, 0, 1, 1], [], []>} : vector<4x128xbf16>, vector<128x128xbf16>, vector<4x128xf32> -> vector<4x128xf32>
      %92 = vector.broadcast %84 : f32 to vector<4x128xf32>
      %93 = arith.mulf %91, %92 : vector<4x128xf32>
      %94 = vector.broadcast %27 : vector<1x128xf32> to vector<4x128xf32>
      %95 = arith.addf %93, %94 : vector<4x128xf32>
      %96 = math.tanh %95 : vector<4x128xf32>
      %97 = vector.broadcast %86 : f32 to vector<4x128xf32>
      %98 = arith.mulf %97, %96 : vector<4x128xf32>
      %99 = arith.subf %89, %98 : vector<4x128xf32>
      %100 = vector.broadcast %85 : f32 to vector<4x128xf32>
      %101 = arith.mulf %99, %100 : vector<4x128xf32>
      %102 = vector.broadcast %87 : f32 to vector<4x128xf32>
      %103 = arith.mulf %102, %101 : vector<4x128xf32>
      %104 = vector.broadcast %88 : f32 to vector<4x128xf32>
      %105 = arith.mulf %104, %96 : vector<4x128xf32>
      %106 = arith.addf %103, %105 : vector<4x128xf32>
      %c0_49 = arith.constant 0 : index
      %c0_50 = arith.constant 0 : index
      %107 = vector.load %arg10[%c0_49, %c0_50] : memref<4x128xf32, #tpu.memory_space<vmem>>, vector<4x128xf32>
      tpu.vector_store %arg10[%c0_49, %c0_50], %106 {strides = array<i32>} : memref<4x128xf32, #tpu.memory_space<vmem>>, vector<4x128xf32>,
      %c0_51 = arith.constant 0 : index
      %c0_52 = arith.constant 0 : index
      %108 = vector.load %arg11[%c0_51, %c0_52] : memref<4x128xf32, #tpu.memory_space<vmem>>, vector<4x128xf32>
      tpu.vector_store %arg11[%c0_51, %c0_52], %96 {strides = array<i32>} : memref<4x128xf32, #tpu.memory_space<vmem>>, vector<4x128xf32>,
    } else {
    }
    %c13 = arith.constant 13 : index
    %32 = memref.load %arg0[%c13] : memref<41xf32, #tpu.memory_space<smem>>
    %cst_22 = arith.constant 5.000000e-01 : f32
    %33 = arith.cmpf ogt, %32, %cst_22 : f32
    %34 = arith.extui %33 : i1 to i32
    %c0_i32_23 = arith.constant 0 : i32
    %35 = arith.cmpi ne, %34, %c0_i32_23 : i32
    scf.if %35 {
      %c8 = arith.constant 8 : index
      %84 = memref.load %arg0[%c8] : memref<41xf32, #tpu.memory_space<smem>>
      %c9 = arith.constant 9 : index
      %85 = memref.load %arg0[%c9] : memref<41xf32, #tpu.memory_space<smem>>
      %c10 = arith.constant 10 : index
      %86 = memref.load %arg0[%c10] : memref<41xf32, #tpu.memory_space<smem>>
      %c11 = arith.constant 11 : index
      %87 = memref.load %arg0[%c11] : memref<41xf32, #tpu.memory_space<smem>>
      %c12 = arith.constant 12 : index
      %88 = memref.load %arg0[%c12] : memref<41xf32, #tpu.memory_space<smem>>
      %c0_46 = arith.constant 0 : index
      %c0_47 = arith.constant 0 : index
      %89 = vector.load %arg10[%c0_46, %c0_47] : memref<4x128xf32, #tpu.memory_space<vmem>>, vector<4x128xf32>
      %90 = arith.truncf %89 : vector<4x128xf32> to vector<4x128xbf16>
      %cst_48 = arith.constant dense<0.000000e+00> : vector<4x128xf32>
      %91 = tpu.matmul %90, %26, %cst_48 {dimension_numbers = #tpu.dot_dimension_numbers<[1], [0], [0], [1], [0, 0, 1, 1], [], []>} : vector<4x128xbf16>, vector<128x128xbf16>, vector<4x128xf32> -> vector<4x128xf32>
      %92 = vector.broadcast %84 : f32 to vector<4x128xf32>
      %93 = arith.mulf %91, %92 : vector<4x128xf32>
      %94 = vector.broadcast %27 : vector<1x128xf32> to vector<4x128xf32>
      %95 = arith.addf %93, %94 : vector<4x128xf32>
      %96 = math.tanh %95 : vector<4x128xf32>
      %97 = vector.broadcast %86 : f32 to vector<4x128xf32>
      %98 = arith.mulf %97, %96 : vector<4x128xf32>
      %99 = arith.subf %89, %98 : vector<4x128xf32>
      %100 = vector.broadcast %85 : f32 to vector<4x128xf32>
      %101 = arith.mulf %99, %100 : vector<4x128xf32>
      %102 = vector.broadcast %87 : f32 to vector<4x128xf32>
      %103 = arith.mulf %102, %101 : vector<4x128xf32>
      %104 = vector.broadcast %88 : f32 to vector<4x128xf32>
      %105 = arith.mulf %104, %96 : vector<4x128xf32>
      %106 = arith.addf %103, %105 : vector<4x128xf32>
      %c0_49 = arith.constant 0 : index
      %c0_50 = arith.constant 0 : index
      %107 = vector.load %arg10[%c0_49, %c0_50] : memref<4x128xf32, #tpu.memory_space<vmem>>, vector<4x128xf32>
      tpu.vector_store %arg10[%c0_49, %c0_50], %106 {strides = array<i32>} : memref<4x128xf32, #tpu.memory_space<vmem>>, vector<4x128xf32>,
      %c0_51 = arith.constant 0 : index
      %c0_52 = arith.constant 0 : index
      %108 = vector.load %arg11[%c0_51, %c0_52] : memref<4x128xf32, #tpu.memory_space<vmem>>, vector<4x128xf32>
      tpu.vector_store %arg11[%c0_51, %c0_52], %96 {strides = array<i32>} : memref<4x128xf32, #tpu.memory_space<vmem>>, vector<4x128xf32>,
    } else {
    }
    %c19 = arith.constant 19 : index
    %36 = memref.load %arg0[%c19] : memref<41xf32, #tpu.memory_space<smem>>
    %cst_24 = arith.constant 5.000000e-01 : f32
    %37 = arith.cmpf ogt, %36, %cst_24 : f32
    %38 = arith.extui %37 : i1 to i32
    %c0_i32_25 = arith.constant 0 : i32
    %39 = arith.cmpi ne, %38, %c0_i32_25 : i32
    scf.if %39 {
      %c14 = arith.constant 14 : index
      %84 = memref.load %arg0[%c14] : memref<41xf32, #tpu.memory_space<smem>>
      %c15 = arith.constant 15 : index
      %85 = memref.load %arg0[%c15] : memref<41xf32, #tpu.memory_space<smem>>
      %c16 = arith.constant 16 : index
      %86 = memref.load %arg0[%c16] : memref<41xf32, #tpu.memory_space<smem>>
      %c17 = arith.constant 17 : index
      %87 = memref.load %arg0[%c17] : memref<41xf32, #tpu.memory_space<smem>>
      %c18 = arith.constant 18 : index
      %88 = memref.load %arg0[%c18] : memref<41xf32, #tpu.memory_space<smem>>
      %c0_46 = arith.constant 0 : index
      %c0_47 = arith.constant 0 : index
      %89 = vector.load %arg10[%c0_46, %c0_47] : memref<4x128xf32, #tpu.memory_space<vmem>>, vector<4x128xf32>
      %90 = arith.truncf %89 : vector<4x128xf32> to vector<4x128xbf16>
      %cst_48 = arith.constant dense<0.000000e+00> : vector<4x128xf32>
      %91 = tpu.matmul %90, %26, %cst_48 {dimension_numbers = #tpu.dot_dimension_numbers<[1], [0], [0], [1], [0, 0, 1, 1], [], []>} : vector<4x128xbf16>, vector<128x128xbf16>, vector<4x128xf32> -> vector<4x128xf32>
      %92 = vector.broadcast %84 : f32 to vector<4x128xf32>
      %93 = arith.mulf %91, %92 : vector<4x128xf32>
      %94 = vector.broadcast %27 : vector<1x128xf32> to vector<4x128xf32>
      %95 = arith.addf %93, %94 : vector<4x128xf32>
      %96 = math.tanh %95 : vector<4x128xf32>
      %97 = vector.broadcast %86 : f32 to vector<4x128xf32>
      %98 = arith.mulf %97, %96 : vector<4x128xf32>
      %99 = arith.subf %89, %98 : vector<4x128xf32>
      %100 = vector.broadcast %85 : f32 to vector<4x128xf32>
      %101 = arith.mulf %99, %100 : vector<4x128xf32>
      %102 = vector.broadcast %87 : f32 to vector<4x128xf32>
      %103 = arith.mulf %102, %101 : vector<4x128xf32>
      %104 = vector.broadcast %88 : f32 to vector<4x128xf32>
      %105 = arith.mulf %104, %96 : vector<4x128xf32>
      %106 = arith.addf %103, %105 : vector<4x128xf32>
      %c0_49 = arith.constant 0 : index
      %c0_50 = arith.constant 0 : index
      %107 = vector.load %arg10[%c0_49, %c0_50] : memref<4x128xf32, #tpu.memory_space<vmem>>, vector<4x128xf32>
      tpu.vector_store %arg10[%c0_49, %c0_50], %106 {strides = array<i32>} : memref<4x128xf32, #tpu.memory_space<vmem>>, vector<4x128xf32>,
      %c0_51 = arith.constant 0 : index
      %c0_52 = arith.constant 0 : index
      %108 = vector.load %arg11[%c0_51, %c0_52] : memref<4x128xf32, #tpu.memory_space<vmem>>, vector<4x128xf32>
      tpu.vector_store %arg11[%c0_51, %c0_52], %96 {strides = array<i32>} : memref<4x128xf32, #tpu.memory_space<vmem>>, vector<4x128xf32>,
    } else {
    }
    %c25 = arith.constant 25 : index
    %40 = memref.load %arg0[%c25] : memref<41xf32, #tpu.memory_space<smem>>
    %cst_26 = arith.constant 5.000000e-01 : f32
    %41 = arith.cmpf ogt, %40, %cst_26 : f32
    %42 = arith.extui %41 : i1 to i32
    %c0_i32_27 = arith.constant 0 : i32
    %43 = arith.cmpi ne, %42, %c0_i32_27 : i32
    scf.if %43 {
      %c20 = arith.constant 20 : index
      %84 = memref.load %arg0[%c20] : memref<41xf32, #tpu.memory_space<smem>>
      %c21 = arith.constant 21 : index
      %85 = memref.load %arg0[%c21] : memref<41xf32, #tpu.memory_space<smem>>
      %c22 = arith.constant 22 : index
      %86 = memref.load %arg0[%c22] : memref<41xf32, #tpu.memory_space<smem>>
      %c23 = arith.constant 23 : index
      %87 = memref.load %arg0[%c23] : memref<41xf32, #tpu.memory_space<smem>>
      %c24 = arith.constant 24 : index
      %88 = memref.load %arg0[%c24] : memref<41xf32, #tpu.memory_space<smem>>
      %c0_46 = arith.constant 0 : index
      %c0_47 = arith.constant 0 : index
      %89 = vector.load %arg10[%c0_46, %c0_47] : memref<4x128xf32, #tpu.memory_space<vmem>>, vector<4x128xf32>
      %90 = arith.truncf %89 : vector<4x128xf32> to vector<4x128xbf16>
      %cst_48 = arith.constant dense<0.000000e+00> : vector<4x128xf32>
      %91 = tpu.matmul %90, %26, %cst_48 {dimension_numbers = #tpu.dot_dimension_numbers<[1], [0], [0], [1], [0, 0, 1, 1], [], []>} : vector<4x128xbf16>, vector<128x128xbf16>, vector<4x128xf32> -> vector<4x128xf32>
      %92 = vector.broadcast %84 : f32 to vector<4x128xf32>
      %93 = arith.mulf %91, %92 : vector<4x128xf32>
      %94 = vector.broadcast %27 : vector<1x128xf32> to vector<4x128xf32>
      %95 = arith.addf %93, %94 : vector<4x128xf32>
      %96 = math.tanh %95 : vector<4x128xf32>
      %97 = vector.broadcast %86 : f32 to vector<4x128xf32>
      %98 = arith.mulf %97, %96 : vector<4x128xf32>
      %99 = arith.subf %89, %98 : vector<4x128xf32>
      %100 = vector.broadcast %85 : f32 to vector<4x128xf32>
      %101 = arith.mulf %99, %100 : vector<4x128xf32>
      %102 = vector.broadcast %87 : f32 to vector<4x128xf32>
      %103 = arith.mulf %102, %101 : vector<4x128xf32>
      %104 = vector.broadcast %88 : f32 to vector<4x128xf32>
      %105 = arith.mulf %104, %96 : vector<4x128xf32>
      %106 = arith.addf %103, %105 : vector<4x128xf32>
      %c0_49 = arith.constant 0 : index
      %c0_50 = arith.constant 0 : index
      %107 = vector.load %arg10[%c0_49, %c0_50] : memref<4x128xf32, #tpu.memory_space<vmem>>, vector<4x128xf32>
      tpu.vector_store %arg10[%c0_49, %c0_50], %106 {strides = array<i32>} : memref<4x128xf32, #tpu.memory_space<vmem>>, vector<4x128xf32>,
      %c0_51 = arith.constant 0 : index
      %c0_52 = arith.constant 0 : index
      %108 = vector.load %arg11[%c0_51, %c0_52] : memref<4x128xf32, #tpu.memory_space<vmem>>, vector<4x128xf32>
      tpu.vector_store %arg11[%c0_51, %c0_52], %96 {strides = array<i32>} : memref<4x128xf32, #tpu.memory_space<vmem>>, vector<4x128xf32>,
    } else {
    }
    %c31 = arith.constant 31 : index
    %44 = memref.load %arg0[%c31] : memref<41xf32, #tpu.memory_space<smem>>
    %cst_28 = arith.constant 5.000000e-01 : f32
    %45 = arith.cmpf ogt, %44, %cst_28 : f32
    %46 = arith.extui %45 : i1 to i32
    %c0_i32_29 = arith.constant 0 : i32
    %47 = arith.cmpi ne, %46, %c0_i32_29 : i32
    scf.if %47 {
      %c26 = arith.constant 26 : index
      %84 = memref.load %arg0[%c26] : memref<41xf32, #tpu.memory_space<smem>>
      %c27 = arith.constant 27 : index
      %85 = memref.load %arg0[%c27] : memref<41xf32, #tpu.memory_space<smem>>
      %c28 = arith.constant 28 : index
      %86 = memref.load %arg0[%c28] : memref<41xf32, #tpu.memory_space<smem>>
      %c29 = arith.constant 29 : index
      %87 = memref.load %arg0[%c29] : memref<41xf32, #tpu.memory_space<smem>>
      %c30 = arith.constant 30 : index
      %88 = memref.load %arg0[%c30] : memref<41xf32, #tpu.memory_space<smem>>
      %c0_46 = arith.constant 0 : index
      %c0_47 = arith.constant 0 : index
      %89 = vector.load %arg10[%c0_46, %c0_47] : memref<4x128xf32, #tpu.memory_space<vmem>>, vector<4x128xf32>
      %90 = arith.truncf %89 : vector<4x128xf32> to vector<4x128xbf16>
      %cst_48 = arith.constant dense<0.000000e+00> : vector<4x128xf32>
      %91 = tpu.matmul %90, %26, %cst_48 {dimension_numbers = #tpu.dot_dimension_numbers<[1], [0], [0], [1], [0, 0, 1, 1], [], []>} : vector<4x128xbf16>, vector<128x128xbf16>, vector<4x128xf32> -> vector<4x128xf32>
      %92 = vector.broadcast %84 : f32 to vector<4x128xf32>
      %93 = arith.mulf %91, %92 : vector<4x128xf32>
      %94 = vector.broadcast %27 : vector<1x128xf32> to vector<4x128xf32>
      %95 = arith.addf %93, %94 : vector<4x128xf32>
      %96 = math.tanh %95 : vector<4x128xf32>
      %97 = vector.broadcast %86 : f32 to vector<4x128xf32>
      %98 = arith.mulf %97, %96 : vector<4x128xf32>
      %99 = arith.subf %89, %98 : vector<4x128xf32>
      %100 = vector.broadcast %85 : f32 to vector<4x128xf32>
      %101 = arith.mulf %99, %100 : vector<4x128xf32>
      %102 = vector.broadcast %87 : f32 to vector<4x128xf32>
      %103 = arith.mulf %102, %101 : vector<4x128xf32>
      %104 = vector.broadcast %88 : f32 to vector<4x128xf32>
      %105 = arith.mulf %104, %96 : vector<4x128xf32>
      %106 = arith.addf %103, %105 : vector<4x128xf32>
      %c0_49 = arith.constant 0 : index
      %c0_50 = arith.constant 0 : index
      %107 = vector.load %arg10[%c0_49, %c0_50] : memref<4x128xf32, #tpu.memory_space<vmem>>, vector<4x128xf32>
      tpu.vector_store %arg10[%c0_49, %c0_50], %106 {strides = array<i32>} : memref<4x128xf32, #tpu.memory_space<vmem>>, vector<4x128xf32>,
      %c0_51 = arith.constant 0 : index
      %c0_52 = arith.constant 0 : index
      %108 = vector.load %arg11[%c0_51, %c0_52] : memref<4x128xf32, #tpu.memory_space<vmem>>, vector<4x128xf32>
      tpu.vector_store %arg11[%c0_51, %c0_52], %96 {strides = array<i32>} : memref<4x128xf32, #tpu.memory_space<vmem>>, vector<4x128xf32>,
    } else {
    }
    %c37 = arith.constant 37 : index
    %48 = memref.load %arg0[%c37] : memref<41xf32, #tpu.memory_space<smem>>
    %cst_30 = arith.constant 5.000000e-01 : f32
    %49 = arith.cmpf ogt, %48, %cst_30 : f32
    %50 = arith.extui %49 : i1 to i32
    %c0_i32_31 = arith.constant 0 : i32
    %51 = arith.cmpi ne, %50, %c0_i32_31 : i32
    scf.if %51 {
      %c32 = arith.constant 32 : index
      %84 = memref.load %arg0[%c32] : memref<41xf32, #tpu.memory_space<smem>>
      %c33 = arith.constant 33 : index
      %85 = memref.load %arg0[%c33] : memref<41xf32, #tpu.memory_space<smem>>
      %c34 = arith.constant 34 : index
      %86 = memref.load %arg0[%c34] : memref<41xf32, #tpu.memory_space<smem>>
      %c35 = arith.constant 35 : index
      %87 = memref.load %arg0[%c35] : memref<41xf32, #tpu.memory_space<smem>>
      %c36 = arith.constant 36 : index
      %88 = memref.load %arg0[%c36] : memref<41xf32, #tpu.memory_space<smem>>
      %c0_46 = arith.constant 0 : index
      %c0_47 = arith.constant 0 : index
      %89 = vector.load %arg10[%c0_46, %c0_47] : memref<4x128xf32, #tpu.memory_space<vmem>>, vector<4x128xf32>
      %90 = arith.truncf %89 : vector<4x128xf32> to vector<4x128xbf16>
      %cst_48 = arith.constant dense<0.000000e+00> : vector<4x128xf32>
      %91 = tpu.matmul %90, %26, %cst_48 {dimension_numbers = #tpu.dot_dimension_numbers<[1], [0], [0], [1], [0, 0, 1, 1], [], []>} : vector<4x128xbf16>, vector<128x128xbf16>, vector<4x128xf32> -> vector<4x128xf32>
      %92 = vector.broadcast %84 : f32 to vector<4x128xf32>
      %93 = arith.mulf %91, %92 : vector<4x128xf32>
      %94 = vector.broadcast %27 : vector<1x128xf32> to vector<4x128xf32>
      %95 = arith.addf %93, %94 : vector<4x128xf32>
      %96 = math.tanh %95 : vector<4x128xf32>
      %97 = vector.broadcast %86 : f32 to vector<4x128xf32>
      %98 = arith.mulf %97, %96 : vector<4x128xf32>
      %99 = arith.subf %89, %98 : vector<4x128xf32>
      %100 = vector.broadcast %85 : f32 to vector<4x128xf32>
      %101 = arith.mulf %99, %100 : vector<4x128xf32>
      %102 = vector.broadcast %87 : f32 to vector<4x128xf32>
      %103 = arith.mulf %102, %101 : vector<4x128xf32>
      %104 = vector.broadcast %88 : f32 to vector<4x128xf32>
      %105 = arith.mulf %104, %96 : vector<4x128xf32>
      %106 = arith.addf %103, %105 : vector<4x128xf32>
      %c0_49 = arith.constant 0 : index
      %c0_50 = arith.constant 0 : index
      %107 = vector.load %arg10[%c0_49, %c0_50] : memref<4x128xf32, #tpu.memory_space<vmem>>, vector<4x128xf32>
      tpu.vector_store %arg10[%c0_49, %c0_50], %106 {strides = array<i32>} : memref<4x128xf32, #tpu.memory_space<vmem>>, vector<4x128xf32>,
      %c0_51 = arith.constant 0 : index
      %c0_52 = arith.constant 0 : index
      %108 = vector.load %arg11[%c0_51, %c0_52] : memref<4x128xf32, #tpu.memory_space<vmem>>, vector<4x128xf32>
      tpu.vector_store %arg11[%c0_51, %c0_52], %96 {strides = array<i32>} : memref<4x128xf32, #tpu.memory_space<vmem>>, vector<4x128xf32>,
    } else {
    }
    %c38 = arith.constant 38 : index
    %52 = memref.load %arg0[%c38] : memref<41xf32, #tpu.memory_space<smem>>
    %c39 = arith.constant 39 : index
    %53 = memref.load %arg0[%c39] : memref<41xf32, #tpu.memory_space<smem>>
    %c40 = arith.constant 40 : index
    %54 = memref.load %arg0[%c40] : memref<41xf32, #tpu.memory_space<smem>>
    %c0_32 = arith.constant 0 : index
    %c0_33 = arith.constant 0 : index
    %55 = vector.load %arg10[%c0_32, %c0_33] : memref<4x128xf32, #tpu.memory_space<vmem>>, vector<4x128xf32>
    %56 = arith.truncf %55 : vector<4x128xf32> to vector<4x128xbf16>
    %cst_34 = arith.constant dense<0.000000e+00> : vector<4x128xf32>
    %57 = tpu.matmul %56, %26, %cst_34 {dimension_numbers = #tpu.dot_dimension_numbers<[1], [0], [0], [1], [0, 0, 1, 1], [], []>} : vector<4x128xbf16>, vector<128x128xbf16>, vector<4x128xf32> -> vector<4x128xf32>
    %58 = vector.broadcast %52 : f32 to vector<4x128xf32>
    %59 = arith.mulf %57, %58 : vector<4x128xf32>
    %c0_35 = arith.constant 0 : index
    %c0_36 = arith.constant 0 : index
    %60 = vector.load %arg6[%c0_35, %c0_36] : memref<1x128xf32, #tpu.memory_space<vmem>>, vector<1x128xf32>
    %61 = vector.broadcast %60 : vector<1x128xf32> to vector<4x128xf32>
    %62 = arith.addf %59, %61 : vector<4x128xf32>
    %63 = math.tanh %62 : vector<4x128xf32>
    %c0_37 = arith.constant 0 : index
    %c0_38 = arith.constant 0 : index
    %64 = vector.load %arg7[%c0_37, %c0_38] : memref<1x128xf32, #tpu.memory_space<vmem>>, vector<1x128xf32>
    %65 = vector.broadcast %64 : vector<1x128xf32> to vector<4x128xf32>
    %66 = arith.addf %59, %65 : vector<4x128xf32>
    %67 = math.tanh %66 : vector<4x128xf32>
    %68 = arith.subf %67, %63 : vector<4x128xf32>
    %69 = vector.broadcast %54 : f32 to vector<4x128xf32>
    %70 = arith.mulf %69, %68 : vector<4x128xf32>
    %71 = arith.addf %63, %70 : vector<4x128xf32>
    %c0_39 = arith.constant 0 : index
    %c0_40 = arith.constant 0 : index
    %72 = vector.load %arg11[%c0_39, %c0_40] : memref<4x128xf32, #tpu.memory_space<vmem>>, vector<4x128xf32>
    %73 = arith.subf %71, %72 : vector<4x128xf32>
    %74 = vector.broadcast %53 : f32 to vector<4x128xf32>
    %75 = arith.mulf %74, %73 : vector<4x128xf32>
    %76 = arith.cmpf one, %75, %75 : vector<4x128xf32>
    %cst_41 = arith.constant 0.000000e+00 : f32
    %77 = vector.broadcast %cst_41 : f32 to vector<4x128xf32>
    %78 = arith.select %76, %77, %75 : vector<4x128xi1>, vector<4x128xf32>
    %cst_42 = arith.constant -3.40282347E+38 : f32
    %cst_43 = arith.constant 3.40282347E+38 : f32
    %79 = vector.broadcast %cst_42 : f32 to vector<4x128xf32>
    %80 = arith.maximumf %79, %78 : vector<4x128xf32>
    %81 = vector.broadcast %cst_43 : f32 to vector<4x128xf32>
    %82 = arith.minimumf %81, %80 : vector<4x128xf32>
    %c0_44 = arith.constant 0 : index
    %c0_45 = arith.constant 0 : index
    %83 = vector.load %arg9[%c0_44, %c0_45] : memref<4x128xf32, #tpu.memory_space<vmem>>, vector<4x128xf32>
    tpu.vector_store %arg9[%c0_44, %c0_45], %82 {strides = array<i32>} : memref<4x128xf32, #tpu.memory_space<vmem>>, vector<4x128xf32>,
    return
  }
}

</mosaic_0001>

<bundles_post_ra>
// kernel: _ism_forward.3
= control target key start
LH: loop header
LB: loop body
LE: loop exit
PB: predicated region body
PF: predicated region fallthrough
CT: control target
= control target key end

     0   :  { %14 = vsyncpa [#allocation5], 0  ;;  %s1854_s0 = inlined_call_operand.vmem [shape: f32[41], index: 0, kind: input, shape index: {}]   ;;  %s1855_s1 = inlined_call_operand.vmem [shape: f32[192,128], index: 1, kind: input, shape index: {}]   ;;  %s1856_s2 = inlined_call_operand.vmem [shape: bf16[4,192], index: 2, kind: input, shape index: {}]   ;;  %s1857_s3 = inlined_call_operand.vmem [shape: f32[4,128], index: 3, kind: input, shape index: {}]   ;;  %s1858_s4 = inlined_call_operand.vmem [shape: f32[4,1], index: 4, kind: input, shape index: {}]   ;;  %s1859_s5 = inlined_call_operand.vmem [shape: f32[1,128], index: 5, kind: input, shape index: {}]   ;;  %s1860_s6 = inlined_call_operand.vmem [shape: f32[1,128], index: 6, kind: input, shape index: {}]   ;;  %s1861_s7 = inlined_call_operand.vmem [shape: f32[1,128], index: 7, kind: input, shape index: {}]   ;;  %s1862_s8 = inlined_call_operand.vmem [shape: bf16[128,128], index: 8, kind: input, shape index: {}]   ;;  %s1863_s9 = inlined_call_operand.vmem [shape: f32[4,128], index: 9, kind: output, shape index: {}]  }
   0x1   :  { %s21_s11 = sshll.u32 %s1854_s0, 4  ;;  %s22_s11 = int_to_ptr.vmem [resolvable:$true] %s21_s11 }
   0x2   :  { %s1445_s12 = scalar_lea.vmem %s22_s11, 16  ;;  %p1450_p1 = scmp.lt.s32.totalorder %s22_s11, %s22_s11 }
   0x3   :  { %p1446_p0 = scmp.ne.s32.totalorder %s22_s11, %s1445_s12  ;;  %p1451_p2 = scmp.lt.s32.totalorder %s1445_s12, %s1445_s12 }
   0x5   :  { %p1452_p3 = por %p1451_p2, %p1450_p1 }
   0x7   :  { %p1453_p4 = pnand %p1452_p3, %p1446_p0 }
   0x9   :  { %1456 = shalt.err (!%p1453_p4)
}
   0xa   :  { %s1459_s13 = smov [#allocation4]  }
   0xb   :  { %24 = dma.vmem_to_smem %s22_s11, 16, %s1459_s13, [#allocation5]  }
   0xc   :  { %1457 = dma.done.wait [#allocation5], 16  }
   0xd   :  { %1458 = vsyncadd [#allocation5], 4294967280 }
   0xe   :  { %44 = sfence }
   0xf   :  { %v46_v0 = vld [vmem:[%s1855_s1] sm:$0xff]  ;;  %v47_v1 = vld [vmem:[%s1855_s1 + $0x8] sm:$0xff]  ;;  %v48_v2 = vld [vmem:[%s1855_s1 + $0x10] sm:$0xff]  ;;  %v1460_v3 = vmov 0   ;;  %vm141_vm0 = vcmask 523264   ;;  %s1110_s27 = sld [smem:[#allocation4 + $0x1]] }
  0x10   :  { %145 = vmatprep.subr.bf16.mxu0 %v1460_v3  ;;  %v70_v4 = vmul.f32 2.0, %v46_v0  ;;  %v71_v5 = vmul.f32 2.0, %v47_v1  ;;  %v49_v6 = vld [vmem:[%s1855_s1 + $0x18] sm:$0xff]  ;;  %v72_v7 = vmul.f32 2.0, %v48_v2  ;;  %v50_v8 = vld [vmem:[%s1855_s1 + $0x20] sm:$0xff]  ;;  %v51_v9 = vld [vmem:[%s1855_s1 + $0x28] sm:$0xff]  ;;  %1428 = vset.pattern.permute.xlu0 %v1460_v3 }
  0x11   :  { %v73_v10 = vmul.f32 2.0, %v49_v6  ;;  %v74_v11 = vmul.f32 2.0, %v50_v8  ;;  %v75_v15 = vmul.f32 2.0, %v51_v9  ;;  %v52_v16 = vld [vmem:[%s1855_s1 + $0x30] sm:$0xff]  ;;  %v53_v18 = vld [vmem:[%s1855_s1 + $0x38] sm:$0xff]  ;;  %v54_v25 = vld [vmem:[%s1855_s1 + $0x40] sm:$0xff] }
  0x12   :  { %v1084_v12 = vadd.f32 -1.0, %v70_v4  ;;  %v1085_v13 = vadd.f32 -1.0, %v71_v5  ;;  %v1086_v14 = vadd.f32 -1.0, %v72_v7  ;;  %v76_v20 = vmul.f32 2.0, %v52_v16  ;;  %v55_v26 = vld [vmem:[%s1855_s1 + $0x48] sm:$0xff]  ;;  %v56_v32 = vld [vmem:[%s1855_s1 + $0x50] sm:$0xff] }
  0x13   :  { %v1087_v17 = vadd.f32 -1.0, %v73_v10  ;;  %v1088_v22 = vadd.f32 -1.0, %v74_v11  ;;  %v1089_v23 = vadd.f32 -1.0, %v75_v15  ;;  %v77_v24 = vmul.f32 2.0, %v53_v18  ;;  %v57_v33 = vld [vmem:[%s1855_s1 + $0x58] sm:$0xff]  ;;  %v58_v37 = vld [vmem:[%s1855_s1 + $0x60] sm:$0xff] }
  0x14   :  { %v118_v19 = vpack.c.bf16 %v1085_v13, %v1084_v12  ;;  %v78_v27 = vmul.f32 2.0, %v54_v25  ;;  %v1090_v29 = vadd.f32 -1.0, %v76_v20  ;;  %v79_v31 = vmul.f32 2.0, %v55_v26  ;;  %v187_v34 = vld [vmem:[%s1858_s4] sm:$0xf]  ;;  %v59_v42 = vld [vmem:[%s1855_s1 + $0x68] sm:$0xff] }
  0x15   :  { %v119_v21 = vpack.c.bf16 %v1087_v17, %v1086_v14  ;;  %v120_v28 = vpack.c.bf16 %v1089_v23, %v1088_v22  ;;  %v1091_v30 = vadd.f32 -1.0, %v77_v24  ;;  %v80_v36 = vmul.f32 2.0, %v56_v32  ;;  %v1577_v41 = vld.sshfl [vmem:[%s1856_s2] sm:$0x33 pattern:$0x76325410] }
  0x16   :  { %146 = vmatpush1.bf16.msra.mxu0 %v118_v19  ;;  %v1092_v35 = vadd.f32 -1.0, %v78_v27  ;;  %v1093_v39 = vadd.f32 -1.0, %v79_v31  ;;  %v81_v40 = vmul.f32 2.0, %v57_v33  ;;  %v139_v43 = vcombine.high %v1577_v41, %v1577_v41  ;;  %v60_v50 = vld [vmem:[%s1855_s1 + $0x70] sm:$0xff]  ;;  %v61_v51 = vld [vmem:[%s1855_s1 + $0x78] sm:$0xff]  ;;  %v62_v57 = vld [vmem:[%s1855_s1 + $0x80] sm:$0xff] }
  0x17   :  { %147 = vmatprep.subr.bf16.mxu0 %v1460_v3  ;;  %v121_v38 = vpack.c.bf16 %v1091_v30, %v1090_v29  ;;  %v188_v44 = vmul.f32 0.1, %v187_v34  ;;  %v82_v45 = vmul.f32 2.0, %v58_v37  ;;  %v1094_v47 = vadd.f32 -1.0, %v80_v36  ;;  %v63_v58 = vld [vmem:[%s1855_s1 + $0x88] sm:$0xff]  ;;  %v64_v0 = vld [vmem:[%s1855_s1 + $0x90] sm:$0xff] }
  0x18   :  { %1109 = vmatprep.mubr.msk.bf16.mxu0 %vm141_vm0, %v139_v43  ;;  %v122_v46 = vpack.c.bf16 %v1093_v39, %v1092_v35  ;;  %v1095_v48 = vadd.f32 -1.0, %v81_v40  ;;  %v83_v49 = vmul.f32 2.0, %v59_v42  ;;  %v84_v52 = vmul.f32 2.0, %v60_v50  ;;  %v65_v1 = vld [vmem:[%s1855_s1 + $0x98] sm:$0xff]  ;;  %v66_v8 = vld [vmem:[%s1855_s1 + $0xa0] sm:$0xff]  ;;  %v67_v9 = vld [vmem:[%s1855_s1 + $0xa8] sm:$0xff] }
  0x19   :  { %191 = vperm.xlu0 %1428, %v188_v44   ;;  %v1096_v54 = vadd.f32 -1.0, %v82_v45  ;;  %v85_v56 = vmul.f32 2.0, %v61_v51  ;;  %v86_v62 = vmul.f32 2.0, %v62_v57  ;;  %v87_v63 = vmul.f32 2.0, %v63_v58  ;;  %v68_v15 = vld [vmem:[%s1855_s1 + $0xb0] sm:$0xff]  ;;  %v69_v16 = vld [vmem:[%s1855_s1 + $0xb8] sm:$0xff] }
  0x1a   :  { %148 = vmatpush1.bf16.msra.mxu0 %v119_v21  ;;  %v123_v53 = vpack.c.bf16 %v1095_v48, %v1094_v47  ;;  %v1097_v55 = vadd.f32 -1.0, %v83_v49  ;;  %v1098_v59 = vadd.f32 -1.0, %v84_v52  ;;  %v88_v2 = vmul.f32 2.0, %v64_v0  ;;  %s1624_s1 = sld [smem:[#allocation4 + $0x7]]  ;;  %v1630_v27 = vld [vmem:[%s1862_s8] sm:$0xf] }
  0x1b   :  { %149 = vmatprep.subr.bf16.mxu0 %v1460_v3  ;;  %v1099_v61 = vadd.f32 -1.0, %v85_v56  ;;  %v1100_v5 = vadd.f32 -1.0, %v86_v62  ;;  %v1101_v6 = vadd.f32 -1.0, %v87_v63  ;;  %v89_v7 = vmul.f32 2.0, %v65_v1  ;;  %v1645_v29 = vld [vmem:[%s1862_s8 + $0xc] sm:$0xf] }
  0x1c   :  { %v124_v60 = vpack.c.bf16 %v1097_v55, %v1096_v54  ;;  %v90_v10 = vmul.f32 2.0, %v66_v8  ;;  %v1102_v12 = vadd.f32 -1.0, %v88_v2  ;;  %v91_v14 = vmul.f32 2.0, %v67_v9  ;;  %v1650_v30 = vld [vmem:[%s1862_s8 + $0x10] sm:$0xf]  ;;  %s195_s28 = sld [smem:[#allocation4]] }
  0x1d   :  { %v125_v4 = vpack.c.bf16 %v1099_v61, %v1098_v59  ;;  %v126_v11 = vpack.c.bf16 %v1101_v6, %v1100_v5  ;;  %v1103_v13 = vadd.f32 -1.0, %v89_v7  ;;  %v92_v20 = vmul.f32 2.0, %v68_v15  ;;  %v1655_v31 = vld [vmem:[%s1862_s8 + $0x14] sm:$0xf]  ;;  %v1660_v32 = vld [vmem:[%s1862_s8 + $0x18] sm:$0xf] }
  0x1e   :  { %150 = vmatpush1.bf16.msra.mxu0 %v120_v28  ;;  %v1104_v17 = vadd.f32 -1.0, %v90_v10  ;;  %v1105_v19 = vadd.f32 -1.0, %v91_v14  ;;  %v93_v21 = vmul.f32 2.0, %v69_v16  ;;  %v1461_v26 = vmov 0.0   ;;  %v1635_v28 = vld [vmem:[%s1862_s8 + $0x4] sm:$0xf] }
  0x1f   :  { %151 = vmatprep.subr.bf16.mxu0 %v1460_v3  ;;  %v127_v18 = vpack.c.bf16 %v1103_v13, %v1102_v12  ;;  %v1106_v23 = vadd.f32 -1.0, %v92_v20  ;;  %203 = vst [vmem:[#allocation3] sm:$0xf] %v1461_v26  ;;  %v1665_v33 = vld [vmem:[%s1862_s8 + $0x1c] sm:$0xf] }
  0x20   :  { %v128_v22 = vpack.c.bf16 %v1105_v19, %v1104_v17  ;;  %v1107_v24 = vadd.f32 -1.0, %v93_v21  ;;  %v1670_v34 = vld [vmem:[%s1862_s8 + $0x20] sm:$0xf]  ;;  %v1675_v35 = vld [vmem:[%s1862_s8 + $0x24] sm:$0xf]  ;;  %p222_p5 = scmp.gt.f32.partialorder %s1624_s1, 0.5 }
  0x21   :  { %v1680_v36 = vld [vmem:[%s1862_s8 + $0x28] sm:$0xf]  ;;  %v1685_v37 = vld [vmem:[%s1862_s8 + $0x2c] sm:$0xf]  ;;  %v1695_v39 = vld [vmem:[%s1862_s8 + $0x34] sm:$0xf]  ;;  %v1117_v56 = vcombine.low (%p222_p5), %v1630_v27, %v1635_v28  ;;  %v1119_v59 = vcombine.low (%p222_p5), %v1650_v30, %v1655_v31  ;;  %v1121_v61 = vcombine.low (%p222_p5), %v1670_v34, %v1675_v35 }
  0x22   :  { %152 = vmatpush1.bf16.msra.mxu0 %v121_v38  ;;  %v129_v25 = vpack.c.bf16 %v1107_v24, %v1106_v23  ;;  %v1690_v38 = vld [vmem:[%s1862_s8 + $0x30] sm:$0xf]  ;;  %v1700_v40 = vld [vmem:[%s1862_s8 + $0x38] sm:$0xf]  ;;  %v1710_v42 = vld [vmem:[%s1859_s5] sm:$0x1]  ;;  %v196_v48 = vstv %s195_s28  ;;  %v1122_v62 = vcombine.low (%p222_p5), %v1680_v36, %v1685_v37 }
  0x23   :  { %153 = vmatprep.subr.bf16.mxu0 %v1460_v3  ;;  %v186_v43 = vld [vmem:[%s1857_s3] sm:$0xf]  ;;  %v1462_v57 = vmov (%p222_p5), 0.0   ;;  %vm1463_vm1 = vmmov (%p222_p5), 0   ;;  %v1123_v63 = vcombine.low (%p222_p5), %v1690_v38, %v1695_v39  ;;  %s1112_s3 = sld [smem:[#allocation4 + $0x2]] (%p222_p5)  ;;  %s1114_s5 = sld [smem:[#allocation4 + $0x4]] (%p222_p5) }
  0x24   :  { %s1115_s1 = sld [smem:[#allocation4 + $0x5]] (%p222_p5)  ;;  %s1116_s10 = sld [smem:[#allocation4 + $0x6]] (%p222_p5) }
  0x26   :  { %154 = vmatpush1.bf16.msra.mxu0 %v122_v46  ;;  %v199_v46 = vstv %s1110_s27 }
  0x27   :  { %155 = vmatprep.subr.bf16.mxu0 %v1460_v3 }
  0x29   :  { %v321_v7 = vstv (%p222_p5), %s1112_s3  ;;  %v331_v15 = vstv (%p222_p5), %s1114_s5 }
  0x2a   :  { %156 = vmatpush1.bf16.msra.mxu0 %v123_v53  ;;  %v336_v20 = vstv (%p222_p5), %s1115_s1  ;;  %v338_v21 = vstv (%p222_p5), %s1116_s10 }
  0x2b   :  { %157 = vmatprep.subr.bf16.mxu0 %v1460_v3 }
  0x2e   :  { %158 = vmatpush1.bf16.msra.mxu0 %v124_v60  ;;  %v1120_v60 = vcombine.low (%p222_p5), %v1660_v32, %v1665_v33 }
  0x2f   :  { %159 = vmatprep.subr.bf16.mxu0 %v1460_v3 }
  0x32   :  { %160 = vmatpush1.bf16.msra.mxu0 %v125_v4  ;;  %v324_v4 = vlaneseq (%p222_p5) }
  0x33   :  { %161 = vmatprep.subr.bf16.mxu0 %v1460_v3 }
  0x34   :  { %v325_v5 = vshrl.u32 (%p222_p5), %v324_v4, 7 }
  0x36   :  { %162 = vmatpush1.bf16.msra.mxu0 %v126_v11  ;;  %v326_v6 = vsub.s32 (%p222_p5), 0, %v325_v5 }
  0x37   :  { %163 = vmatprep.subr.bf16.mxu0 %v1460_v3 }
  0x38   :  { %v327_v8 = vrot.slane (%p222_p5), %v1710_v42, %v326_v6 }
  0x3a   :  { %164 = vmatpush1.bf16.msra.mxu0 %v127_v18 }
  0x3b   :  { %165 = vmatprep.subr.bf16.mxu0 %v1460_v3 }
  0x3e   :  { %166 = vmatpush1.bf16.msra.mxu0 %v128_v22 }
  0x3f   :  { %167 = vmatprep.subr.bf16.mxu0 %v1460_v3  ;;  %v1640_v3 = vld [vmem:[%s1862_s8 + $0x8] sm:$0xf] }
  0x40   :  { %v1118_v58 = vcombine.low (%p222_p5), %v1640_v3, %v1645_v29 }
  0x42   :  { %168 = vmatpush1.bf16.msra.mxu0 %v129_v25 }
  0x43   :  { %1272 = vmatprep.subr.bf16.mxu0 (%p222_p5), %v1462_v57 }
  0x45   :  { %178 = vmatmul.mubr.bf16.vlgmr.msra.gmra.mrb[0].mxu0 %v1577_v41  ;;  %v1705_v41 = vld [vmem:[%s1862_s8 + $0x3c] sm:$0xf]  ;;  %s1113_s8 = sld [smem:[#allocation4 + $0x3]] (%p222_p5) }
  0x46   :  { %1273 = vmatpush3.bf16.msra.mxu0 (%p222_p5), %v1117_v56  ;;  %1288 = vmatprep.mubr.msk.bf16.mxu0 (%p222_p5), %vm1463_vm1, %v1462_v57  ;;  %v1124_v0 = vcombine.low (%p222_p5), %v1700_v40, %v1705_v41 }
  0x47   :  { %1274 = vmatprep.subr.bf16.mxu0 (%p222_p5), %v1462_v57 }
  0x4a   :  { %1275 = vmatpush3.bf16.msra.mxu0 (%p222_p5), %v1118_v58 }
  0x4b   :  { %1276 = vmatprep.subr.bf16.mxu0 (%p222_p5), %v1462_v57  ;;  %v334_v18 = vstv (%p222_p5), %s1113_s8 }
  0x4e   :  { %1277 = vmatpush3.bf16.msra.mxu0 (%p222_p5), %v1119_v59 }
  0x4f   :  { %1278 = vmatprep.subr.bf16.mxu0 (%p222_p5), %v1462_v57 }
  0x52   :  { %1279 = vmatpush3.bf16.msra.mxu0 (%p222_p5), %v1120_v60 }
  0x53   :  { %1280 = vmatprep.subr.bf16.mxu0 (%p222_p5), %v1462_v57 }
  0x56   :  { %1281 = vmatpush3.bf16.msra.mxu0 (%p222_p5), %v1121_v61 }
  0x57   :  { %1282 = vmatprep.subr.bf16.mxu0 (%p222_p5), %v1462_v57 }
  0x5a   :  { %1283 = vmatpush3.bf16.msra.mxu0 (%p222_p5), %v1122_v62 }
  0x5b   :  { %1284 = vmatprep.subr.bf16.mxu0 (%p222_p5), %v1462_v57 }
  0x5e   :  { %1285 = vmatpush3.bf16.msra.mxu0 (%p222_p5), %v1123_v63 }
  0x5f   :  { %1286 = vmatprep.subr.bf16.mxu0 (%p222_p5), %v1462_v57 }
  0x62   :  { %1287 = vmatpush3.bf16.msra.mxu0 (%p222_p5), %v1124_v0 }
  0x98   :  { %v192_v44 = vpop.permute.xlu0 %191 }
  0x99   :  { %v194_v45 = vadd.f32 %v192_v44, %v186_v43 }
  0x9b   :  { %v200_v49 = vmul.f32 %v199_v46, %v194_v45 }
 0x118   :  { %v179_v47 = vpop.f32.mrb[0].mxu0 }
 0x119   :  { %v185_v50 = vmul.f32 0.18215, %v179_v47  ;;  %v181_v51 = vpop.f32.mrb[1].mxu0  ;;  %225 = sbr.rel (!%p222_p5) target bundleno = 535 (0x217), region = 45 }
 0x11a   :  { %v182_v52 = vpop.f32.mrb[2].mxu0 }
 0x11b   :  { %v197_v53 = vmul.f32 %v196_v48, %v185_v50  ;;  %v183_v54 = vpop.f32.mrb[3].mxu0 }
 0x11d   :  { %v201_v55 = vadd.f32 %v200_v49, %v197_v53 }
 0x11f   :  { %202 = vst [vmem:[#allocation2] sm:$0xf] %v201_v55 }
 0x126   :  { %v231_v1 = vld [vmem:[#allocation2] sm:$0xf] }
 0x127   :  { %v232_v2 = vpack.c.bf16 %v231_v1, %v231_v1 }
 0x129   :  { %1289 = vmatmul.mubr.bf16.vlgmr.msra.gmra.mrb[0].mxu0 %v232_v2 }
 0x1fc   :  { %v315_v9 = vpop.f32.mrb[0].mxu0 }
 0x1fd   :  { %v322_v10 = vmul.f32 %v321_v7, %v315_v9  ;;  %v1290_v11 = vpop.f32.mrb[1].mxu0 }
 0x1fe   :  { %v318_v12 = vpop.f32.mrb[2].mxu0 }
 0x1ff   :  { %v329_v13 = vadd.f32 %v327_v8, %v322_v10  ;;  %v1291_v14 = vpop.f32.mrb[3].mxu0 }
 0x201   :  { %1429 = vtanh.f32 %v329_v13 }
 0x20b   :  { %v1430_v16 = vpop.eup %1429 }
 0x20c   :  { %v332_v17 = vmul.f32 %v1430_v16, %v331_v15  ;;  %342 = vst [vmem:[#allocation3] sm:$0xf] %v1430_v16  ;;  %v339_v24 = vmul.f32 %v1430_v16, %v338_v21 }
 0x20e   :  { %v333_v19 = vsub.f32 %v231_v1, %v332_v17 }
 0x210   :  { %v335_v22 = vmul.f32 %v334_v18, %v333_v19 }
 0x212   :  { %v337_v23 = vmul.f32 %v336_v20, %v335_v22 }
 0x214   :  { %v340_v25 = vadd.f32 %v339_v24, %v337_v23 }
 0x216   :  { %341 = vst [vmem:[#allocation2] sm:$0xf] %v340_v25 }
 0x217 PF:  { %s1125_s11 = sld [smem:[#allocation4 + $0xd]] }
 0x21d   :  { %p344_p6 = scmp.gt.f32.partialorder %s1125_s11, 0.5 }
 0x21e   :  { %v1131_v43 = vcombine.low (%p344_p6), %v1630_v27, %v1635_v28  ;;  %v1464_v44 = vmov (%p344_p6), 0.0   ;;  %v1132_v45 = vcombine.low (%p344_p6), %v1640_v3, %v1645_v29  ;;  %vm1465_vm2 = vmmov (%p344_p6), 0   ;;  %v353_v52 = vld [vmem:[#allocation2] sm:$0xf] (%p344_p6)  ;;  %s1126_s12 = sld [smem:[#allocation4 + $0x8]] (%p344_p6)  ;;  %s1128_s13 = sld [smem:[#allocation4 + $0xa]] (%p344_p6) }
 0x21f   :  { %347 = sbr.rel (!%p344_p6) target bundleno = 813 (0x32d), region = 49  ;;  %1292 = vmatprep.subr.bf16.mxu0 (%p344_p6), %v1464_v44  ;;  %1308 = vmatprep.mubr.msk.bf16.mxu0 (%p344_p6), %vm1465_vm2, %v1464_v44  ;;  %v1133_v46 = vcombine.low (%p344_p6), %v1650_v30, %v1655_v31  ;;  %v1134_v47 = vcombine.low (%p344_p6), %v1660_v32, %v1665_v33  ;;  %v1135_v48 = vcombine.low (%p344_p6), %v1670_v34, %v1675_v35  ;;  %v446_v54 = vlaneseq (%p344_p6)  ;;  %s1127_s14 = sld [smem:[#allocation4 + $0x9]] (%p344_p6) }
 0x220   :  { %1293 = vmatpush3.bf16.msra.mxu0 (%p344_p6), %v1131_v43  ;;  %v1136_v49 = vcombine.low (%p344_p6), %v1680_v36, %v1685_v37  ;;  %v1137_v50 = vcombine.low (%p344_p6), %v1690_v38, %v1695_v39  ;;  %v1138_v51 = vcombine.low (%p344_p6), %v1700_v40, %v1705_v41  ;;  %v354_v53 = vpack.c.bf16 (%p344_p6), %v353_v52, %v353_v52  ;;  %s1129_s15 = sld [smem:[#allocation4 + $0xb]] (%p344_p6)  ;;  %s1130_s16 = sld [smem:[#allocation4 + $0xc]] (%p344_p6) }
 0x221   :  { %1294 = vmatprep.subr.bf16.mxu0 (%p344_p6), %v1464_v44  ;;  %v447_v55 = vshrl.u32 (%p344_p6), %v446_v54, 7 }
 0x223   :  { %v448_v56 = vsub.s32 (%p344_p6), 0, %v447_v55 }
 0x224   :  { %1295 = vmatpush3.bf16.msra.mxu0 (%p344_p6), %v1132_v45  ;;  %v443_v57 = vstv (%p344_p6), %s1126_s12  ;;  %v453_v1 = vstv (%p344_p6), %s1128_s13 }
 0x225   :  { %1296 = vmatprep.subr.bf16.mxu0 (%p344_p6), %v1464_v44  ;;  %v449_v58 = vrot.slane (%p344_p6), %v1710_v42, %v448_v56  ;;  %v456_v5 = vstv (%p344_p6), %s1127_s14 }
 0x226   :  { %v458_v7 = vstv %s1129_s15  ;;  %v460_v8 = vstv %s1130_s16 }
 0x228   :  { %1297 = vmatpush3.bf16.msra.mxu0 %v1133_v46 }
 0x229   :  { %1298 = vmatprep.subr.bf16.mxu0 %v1464_v44 }
 0x22c   :  { %1299 = vmatpush3.bf16.msra.mxu0 %v1134_v47 }
 0x22d   :  { %1300 = vmatprep.subr.bf16.mxu0 %v1464_v44 }
 0x230   :  { %1301 = vmatpush3.bf16.msra.mxu0 %v1135_v48 }
 0x231   :  { %1302 = vmatprep.subr.bf16.mxu0 %v1464_v44 }
 0x234   :  { %1303 = vmatpush3.bf16.msra.mxu0 %v1136_v49 }
 0x235   :  { %1304 = vmatprep.subr.bf16.mxu0 %v1464_v44 }
 0x238   :  { %1305 = vmatpush3.bf16.msra.mxu0 %v1137_v50 }
 0x239   :  { %1306 = vmatprep.subr.bf16.mxu0 %v1464_v44 }
 0x23c   :  { %1307 = vmatpush3.bf16.msra.mxu0 %v1138_v51 }
 0x23f   :  { %1309 = vmatmul.mubr.bf16.vlgmr.msra.gmra.mrb[0].mxu0 %v354_v53 }
 0x312   :  { %v437_v59 = vpop.f32.mrb[0].mxu0 }
 0x313   :  { %v444_v60 = vmul.f32 %v443_v57, %v437_v59  ;;  %v1310_v61 = vpop.f32.mrb[1].mxu0 }
 0x314   :  { %v440_v62 = vpop.f32.mrb[2].mxu0 }
 0x315   :  { %v451_v63 = vadd.f32 %v449_v58, %v444_v60  ;;  %v1311_v0 = vpop.f32.mrb[3].mxu0 }
 0x317   :  { %1431 = vtanh.f32 %v451_v63 }
 0x321   :  { %v1432_v2 = vpop.eup %1431 }
 0x322   :  { %v454_v4 = vmul.f32 %v1432_v2, %v453_v1  ;;  %464 = vst [vmem:[#allocation3] sm:$0xf] %v1432_v2  ;;  %v461_v11 = vmul.f32 %v1432_v2, %v460_v8 }
 0x324   :  { %v455_v6 = vsub.f32 %v353_v52, %v454_v4 }
 0x326   :  { %v457_v9 = vmul.f32 %v456_v5, %v455_v6 }
 0x328   :  { %v459_v10 = vmul.f32 %v458_v7, %v457_v9 }
 0x32a   :  { %v462_v12 = vadd.f32 %v461_v11, %v459_v10 }
 0x32c   :  { %463 = vst [vmem:[#allocation2] sm:$0xf] %v462_v12 }
 0x32d PF:  { %s1139_s17 = sld [smem:[#allocation4 + $0x13]] }
 0x333   :  { %p466_p7 = scmp.gt.f32.partialorder %s1139_s17, 0.5 }
 0x334   :  { %v1145_v13 = vcombine.low (%p466_p7), %v1630_v27, %v1635_v28  ;;  %v1466_v14 = vmov (%p466_p7), 0.0   ;;  %v1146_v15 = vcombine.low (%p466_p7), %v1640_v3, %v1645_v29  ;;  %vm1467_vm3 = vmmov (%p466_p7), 0   ;;  %v475_v22 = vld [vmem:[#allocation2] sm:$0xf] (%p466_p7)  ;;  %s1140_s0 = sld [smem:[#allocation4 + $0xe]] (%p466_p7)  ;;  %s1142_s18 = sld [smem:[#allocation4 + $0x10]] (%p466_p7) }
 0x335   :  { %469 = sbr.rel (!%p466_p7) target bundleno = 1091 (0x443), region = 53  ;;  %1312 = vmatprep.subr.bf16.mxu0 (%p466_p7), %v1466_v14  ;;  %1328 = vmatprep.mubr.msk.bf16.mxu0 (%p466_p7), %vm1467_vm3, %v1466_v14  ;;  %v1147_v16 = vcombine.low (%p466_p7), %v1650_v30, %v1655_v31  ;;  %v1148_v17 = vcombine.low (%p466_p7), %v1660_v32, %v1665_v33  ;;  %v1149_v18 = vcombine.low (%p466_p7), %v1670_v34, %v1675_v35  ;;  %v568_v24 = vlaneseq (%p466_p7)  ;;  %s1141_s19 = sld [smem:[#allocation4 + $0xf]] (%p466_p7) }
 0x336   :  { %1313 = vmatpush3.bf16.msra.mxu0 (%p466_p7), %v1145_v13  ;;  %v1150_v19 = vcombine.low (%p466_p7), %v1680_v36, %v1685_v37  ;;  %v1151_v20 = vcombine.low (%p466_p7), %v1690_v38, %v1695_v39  ;;  %v1152_v21 = vcombine.low (%p466_p7), %v1700_v40, %v1705_v41  ;;  %v476_v23 = vpack.c.bf16 (%p466_p7), %v475_v22, %v475_v22  ;;  %s1143_s20 = sld [smem:[#allocation4 + $0x11]] (%p466_p7)  ;;  %s1144_s21 = sld [smem:[#allocation4 + $0x12]] (%p466_p7) }
 0x337   :  { %1314 = vmatprep.subr.bf16.mxu0 (%p466_p7), %v1466_v14  ;;  %v569_v25 = vshrl.u32 (%p466_p7), %v568_v24, 7 }
 0x339   :  { %v570_v43 = vsub.s32 (%p466_p7), 0, %v569_v25 }
 0x33a   :  { %1315 = vmatpush3.bf16.msra.mxu0 (%p466_p7), %v1146_v15  ;;  %v565_v44 = vstv (%p466_p7), %s1140_s0  ;;  %v575_v52 = vstv (%p466_p7), %s1142_s18 }
 0x33b   :  { %1316 = vmatprep.subr.bf16.mxu0 (%p466_p7), %v1466_v14  ;;  %v571_v45 = vrot.slane (%p466_p7), %v1710_v42, %v570_v43  ;;  %v578_v55 = vstv (%p466_p7), %s1141_s19 }
 0x33c   :  { %v580_v57 = vstv %s1143_s20  ;;  %v582_v58 = vstv %s1144_s21 }
 0x33e   :  { %1317 = vmatpush3.bf16.msra.mxu0 %v1147_v16 }
 0x33f   :  { %1318 = vmatprep.subr.bf16.mxu0 %v1466_v14 }
 0x342   :  { %1319 = vmatpush3.bf16.msra.mxu0 %v1148_v17 }
 0x343   :  { %1320 = vmatprep.subr.bf16.mxu0 %v1466_v14 }
 0x346   :  { %1321 = vmatpush3.bf16.msra.mxu0 %v1149_v18 }
 0x347   :  { %1322 = vmatprep.subr.bf16.mxu0 %v1466_v14 }
 0x34a   :  { %1323 = vmatpush3.bf16.msra.mxu0 %v1150_v19 }
 0x34b   :  { %1324 = vmatprep.subr.bf16.mxu0 %v1466_v14 }
 0x34e   :  { %1325 = vmatpush3.bf16.msra.mxu0 %v1151_v20 }
 0x34f   :  { %1326 = vmatprep.subr.bf16.mxu0 %v1466_v14 }
 0x352   :  { %1327 = vmatpush3.bf16.msra.mxu0 %v1152_v21 }
 0x355   :  { %1329 = vmatmul.mubr.bf16.vlgmr.msra.gmra.mrb[0].mxu0 %v476_v23 }
 0x428   :  { %v559_v46 = vpop.f32.mrb[0].mxu0 }
 0x429   :  { %v566_v47 = vmul.f32 %v565_v44, %v559_v46  ;;  %v1330_v48 = vpop.f32.mrb[1].mxu0 }
 0x42a   :  { %v562_v49 = vpop.f32.mrb[2].mxu0 }
 0x42b   :  { %v573_v50 = vadd.f32 %v571_v45, %v566_v47  ;;  %v1331_v51 = vpop.f32.mrb[3].mxu0 }
 0x42d   :  { %1433 = vtanh.f32 %v573_v50 }
 0x437   :  { %v1434_v53 = vpop.eup %1433 }
 0x438   :  { %v576_v54 = vmul.f32 %v1434_v53, %v575_v52  ;;  %586 = vst [vmem:[#allocation3] sm:$0xf] %v1434_v53  ;;  %v583_v61 = vmul.f32 %v1434_v53, %v582_v58 }
 0x43a   :  { %v577_v56 = vsub.f32 %v475_v22, %v576_v54 }
 0x43c   :  { %v579_v59 = vmul.f32 %v578_v55, %v577_v56 }
 0x43e   :  { %v581_v60 = vmul.f32 %v580_v57, %v579_v59 }
 0x440   :  { %v584_v62 = vadd.f32 %v583_v61, %v581_v60 }
 0x442   :  { %585 = vst [vmem:[#allocation2] sm:$0xf] %v584_v62 }
 0x443 PF:  { %s1153_s4 = sld [smem:[#allocation4 + $0x19]] }
 0x449   :  { %p588_p8 = scmp.gt.f32.partialorder %s1153_s4, 0.5 }
 0x44a   :  { %v1159_v63 = vcombine.low (%p588_p8), %v1630_v27, %v1635_v28  ;;  %v1468_v0 = vmov (%p588_p8), 0.0   ;;  %v1160_v1 = vcombine.low (%p588_p8), %v1640_v3, %v1645_v29  ;;  %vm1469_vm4 = vmmov (%p588_p8), 0   ;;  %v597_v9 = vld [vmem:[#allocation2] sm:$0xf] (%p588_p8)  ;;  %s1154_s2 = sld [smem:[#allocation4 + $0x14]] (%p588_p8)  ;;  %s1156_s22 = sld [smem:[#allocation4 + $0x16]] (%p588_p8) }
 0x44b   :  { %591 = sbr.rel (!%p588_p8) target bundleno = 1369 (0x559), region = 57  ;;  %1332 = vmatprep.subr.bf16.mxu0 (%p588_p8), %v1468_v0  ;;  %1348 = vmatprep.mubr.msk.bf16.mxu0 (%p588_p8), %vm1469_vm4, %v1468_v0  ;;  %v1161_v2 = vcombine.low (%p588_p8), %v1650_v30, %v1655_v31  ;;  %v1162_v4 = vcombine.low (%p588_p8), %v1660_v32, %v1665_v33  ;;  %v1163_v5 = vcombine.low (%p588_p8), %v1670_v34, %v1675_v35  ;;  %v690_v11 = vlaneseq (%p588_p8)  ;;  %s1155_s23 = sld [smem:[#allocation4 + $0x15]] (%p588_p8) }
 0x44c   :  { %1333 = vmatpush3.bf16.msra.mxu0 (%p588_p8), %v1159_v63  ;;  %v1164_v6 = vcombine.low (%p588_p8), %v1680_v36, %v1685_v37  ;;  %v1165_v7 = vcombine.low (%p588_p8), %v1690_v38, %v1695_v39  ;;  %v1166_v8 = vcombine.low (%p588_p8), %v1700_v40, %v1705_v41  ;;  %v598_v10 = vpack.c.bf16 (%p588_p8), %v597_v9, %v597_v9  ;;  %s1157_s24 = sld [smem:[#allocation4 + $0x17]] (%p588_p8)  ;;  %s1158_s25 = sld [smem:[#allocation4 + $0x18]] (%p588_p8) }
 0x44d   :  { %1334 = vmatprep.subr.bf16.mxu0 (%p588_p8), %v1468_v0  ;;  %v691_v12 = vshrl.u32 (%p588_p8), %v690_v11, 7 }
 0x44f   :  { %v692_v13 = vsub.s32 (%p588_p8), 0, %v691_v12 }
 0x450   :  { %1335 = vmatpush3.bf16.msra.mxu0 (%p588_p8), %v1160_v1  ;;  %v687_v14 = vstv (%p588_p8), %s1154_s2  ;;  %v697_v22 = vstv (%p588_p8), %s1156_s22 }
 0x451   :  { %1336 = vmatprep.subr.bf16.mxu0 (%p588_p8), %v1468_v0  ;;  %v693_v15 = vrot.slane (%p588_p8), %v1710_v42, %v692_v13  ;;  %v700_v25 = vstv (%p588_p8), %s1155_s23 }
 0x452   :  { %v702_v44 = vstv %s1157_s24  ;;  %v704_v45 = vstv %s1158_s25 }
 0x454   :  { %1337 = vmatpush3.bf16.msra.mxu0 %v1161_v2 }
 0x455   :  { %1338 = vmatprep.subr.bf16.mxu0 %v1468_v0 }
 0x458   :  { %1339 = vmatpush3.bf16.msra.mxu0 %v1162_v4 }
 0x459   :  { %1340 = vmatprep.subr.bf16.mxu0 %v1468_v0 }
 0x45c   :  { %1341 = vmatpush3.bf16.msra.mxu0 %v1163_v5 }
 0x45d   :  { %1342 = vmatprep.subr.bf16.mxu0 %v1468_v0 }
 0x460   :  { %1343 = vmatpush3.bf16.msra.mxu0 %v1164_v6 }
 0x461   :  { %1344 = vmatprep.subr.bf16.mxu0 %v1468_v0 }
 0x464   :  { %1345 = vmatpush3.bf16.msra.mxu0 %v1165_v7 }
 0x465   :  { %1346 = vmatprep.subr.bf16.mxu0 %v1468_v0 }
 0x468   :  { %1347 = vmatpush3.bf16.msra.mxu0 %v1166_v8 }
 0x46b   :  { %1349 = vmatmul.mubr.bf16.vlgmr.msra.gmra.mrb[0].mxu0 %v598_v10 }
 0x53e   :  { %v681_v16 = vpop.f32.mrb[0].mxu0 }
 0x53f   :  { %v688_v17 = vmul.f32 %v687_v14, %v681_v16  ;;  %v1350_v18 = vpop.f32.mrb[1].mxu0 }
 0x540   :  { %v684_v19 = vpop.f32.mrb[2].mxu0 }
 0x541   :  { %v695_v20 = vadd.f32 %v693_v15, %v688_v17  ;;  %v1351_v21 = vpop.f32.mrb[3].mxu0 }
 0x543   :  { %1435 = vtanh.f32 %v695_v20 }
 0x54d   :  { %v1436_v23 = vpop.eup %1435 }
 0x54e   :  { %v698_v24 = vmul.f32 %v1436_v23, %v697_v22  ;;  %708 = vst [vmem:[#allocation3] sm:$0xf] %v1436_v23  ;;  %v705_v48 = vmul.f32 %v1436_v23, %v704_v45 }
 0x550   :  { %v699_v43 = vsub.f32 %v597_v9, %v698_v24 }
 0x552   :  { %v701_v46 = vmul.f32 %v700_v25, %v699_v43 }
 0x554   :  { %v703_v47 = vmul.f32 %v702_v44, %v701_v46 }
 0x556   :  { %v706_v49 = vadd.f32 %v705_v48, %v703_v47 }
 0x558   :  { %707 = vst [vmem:[#allocation2] sm:$0xf] %v706_v49 }
 0x559 PF:  { %s1167_s26 = sld [smem:[#allocation4 + $0x1f]] }
 0x55f   :  { %p710_p9 = scmp.gt.f32.partialorder %s1167_s26, 0.5 }
 0x560   :  { %v1173_v50 = vcombine.low (%p710_p9), %v1630_v27, %v1635_v28  ;;  %v1470_v51 = vmov (%p710_p9), 0.0   ;;  %v1174_v52 = vcombine.low (%p710_p9), %v1640_v3, %v1645_v29  ;;  %vm1471_vm5 = vmmov (%p710_p9), 0   ;;  %v719_v59 = vld [vmem:[#allocation2] sm:$0xf] (%p710_p9)  ;;  %s1168_s27 = sld [smem:[#allocation4 + $0x1a]] (%p710_p9)  ;;  %s1170_s28 = sld [smem:[#allocation4 + $0x1c]] (%p710_p9) }
 0x561   :  { %713 = sbr.rel (!%p710_p9) target bundleno = 1647 (0x66f), region = 61  ;;  %1352 = vmatprep.subr.bf16.mxu0 (%p710_p9), %v1470_v51  ;;  %1368 = vmatprep.mubr.msk.bf16.mxu0 (%p710_p9), %vm1471_vm5, %v1470_v51  ;;  %v1175_v53 = vcombine.low (%p710_p9), %v1650_v30, %v1655_v31  ;;  %v1176_v54 = vcombine.low (%p710_p9), %v1660_v32, %v1665_v33  ;;  %v1177_v55 = vcombine.low (%p710_p9), %v1670_v34, %v1675_v35  ;;  %v812_v61 = vlaneseq (%p710_p9)  ;;  %s1169_s29 = sld [smem:[#allocation4 + $0x1b]] (%p710_p9) }
 0x562   :  { %1353 = vmatpush3.bf16.msra.mxu0 (%p710_p9), %v1173_v50  ;;  %v1178_v56 = vcombine.low (%p710_p9), %v1680_v36, %v1685_v37  ;;  %v1179_v57 = vcombine.low (%p710_p9), %v1690_v38, %v1695_v39  ;;  %v1180_v58 = vcombine.low (%p710_p9), %v1700_v40, %v1705_v41  ;;  %v720_v60 = vpack.c.bf16 (%p710_p9), %v719_v59, %v719_v59  ;;  %s1171_s30 = sld [smem:[#allocation4 + $0x1d]] (%p710_p9)  ;;  %s1172_s3 = sld [smem:[#allocation4 + $0x1e]] (%p710_p9) }
 0x563   :  { %1354 = vmatprep.subr.bf16.mxu0 (%p710_p9), %v1470_v51  ;;  %v813_v62 = vshrl.u32 (%p710_p9), %v812_v61, 7 }
 0x565   :  { %v814_v63 = vsub.s32 (%p710_p9), 0, %v813_v62 }
 0x566   :  { %1355 = vmatpush3.bf16.msra.mxu0 (%p710_p9), %v1174_v52  ;;  %v809_v0 = vstv (%p710_p9), %s1168_s27  ;;  %v819_v9 = vstv (%p710_p9), %s1170_s28 }
 0x567   :  { %1356 = vmatprep.subr.bf16.mxu0 (%p710_p9), %v1470_v51  ;;  %v815_v1 = vrot.slane (%p710_p9), %v1710_v42, %v814_v63  ;;  %v822_v12 = vstv (%p710_p9), %s1169_s29 }
 0x568   :  { %v824_v14 = vstv %s1171_s30  ;;  %v826_v15 = vstv %s1172_s3 }
 0x56a   :  { %1357 = vmatpush3.bf16.msra.mxu0 %v1175_v53 }
 0x56b   :  { %1358 = vmatprep.subr.bf16.mxu0 %v1470_v51 }
 0x56e   :  { %1359 = vmatpush3.bf16.msra.mxu0 %v1176_v54 }
 0x56f   :  { %1360 = vmatprep.subr.bf16.mxu0 %v1470_v51 }
 0x572   :  { %1361 = vmatpush3.bf16.msra.mxu0 %v1177_v55 }
 0x573   :  { %1362 = vmatprep.subr.bf16.mxu0 %v1470_v51 }
 0x576   :  { %1363 = vmatpush3.bf16.msra.mxu0 %v1178_v56 }
 0x577   :  { %1364 = vmatprep.subr.bf16.mxu0 %v1470_v51 }
 0x57a   :  { %1365 = vmatpush3.bf16.msra.mxu0 %v1179_v57 }
 0x57b   :  { %1366 = vmatprep.subr.bf16.mxu0 %v1470_v51 }
 0x57e   :  { %1367 = vmatpush3.bf16.msra.mxu0 %v1180_v58 }
 0x581   :  { %1369 = vmatmul.mubr.bf16.vlgmr.msra.gmra.mrb[0].mxu0 %v720_v60 }
 0x654   :  { %v803_v2 = vpop.f32.mrb[0].mxu0 }
 0x655   :  { %v810_v4 = vmul.f32 %v809_v0, %v803_v2  ;;  %v1370_v5 = vpop.f32.mrb[1].mxu0 }
 0x656   :  { %v806_v6 = vpop.f32.mrb[2].mxu0 }
 0x657   :  { %v817_v7 = vadd.f32 %v815_v1, %v810_v4  ;;  %v1371_v8 = vpop.f32.mrb[3].mxu0 }
 0x659   :  { %1437 = vtanh.f32 %v817_v7 }
 0x663   :  { %v1438_v10 = vpop.eup %1437 }
 0x664   :  { %v820_v11 = vmul.f32 %v1438_v10, %v819_v9  ;;  %830 = vst [vmem:[#allocation3] sm:$0xf] %v1438_v10  ;;  %v827_v18 = vmul.f32 %v1438_v10, %v826_v15 }
 0x666   :  { %v821_v13 = vsub.f32 %v719_v59, %v820_v11 }
 0x668   :  { %v823_v16 = vmul.f32 %v822_v12, %v821_v13 }
 0x66a   :  { %v825_v17 = vmul.f32 %v824_v14, %v823_v16 }
 0x66c   :  { %v828_v19 = vadd.f32 %v827_v18, %v825_v17 }
 0x66e   :  { %829 = vst [vmem:[#allocation2] sm:$0xf] %v828_v19 }
 0x66f PF:  { %s1181_s5 = sld [smem:[#allocation4 + $0x25]] }
 0x675   :  { %p832_p10 = scmp.gt.f32.partialorder %s1181_s5, 0.5 }
 0x676   :  { %v1187_v20 = vcombine.low (%p832_p10), %v1630_v27, %v1635_v28  ;;  %v1472_v21 = vmov (%p832_p10), 0.0   ;;  %v1188_v22 = vcombine.low (%p832_p10), %v1640_v3, %v1645_v29  ;;  %vm1473_vm6 = vmmov (%p832_p10), 0   ;;  %v841_v46 = vld [vmem:[#allocation2] sm:$0xf] (%p832_p10)  ;;  %s1182_s8 = sld [smem:[#allocation4 + $0x20]] (%p832_p10)  ;;  %s1184_s1 = sld [smem:[#allocation4 + $0x22]] (%p832_p10) }
 0x677   :  { %835 = sbr.rel (!%p832_p10) target bundleno = 1925 (0x785), region = 65  ;;  %1372 = vmatprep.subr.bf16.mxu0 (%p832_p10), %v1472_v21  ;;  %1388 = vmatprep.mubr.msk.bf16.mxu0 (%p832_p10), %vm1473_vm6, %v1472_v21  ;;  %v1189_v23 = vcombine.low (%p832_p10), %v1650_v30, %v1655_v31  ;;  %v1190_v24 = vcombine.low (%p832_p10), %v1660_v32, %v1665_v33  ;;  %v1191_v25 = vcombine.low (%p832_p10), %v1670_v34, %v1675_v35  ;;  %v934_v48 = vlaneseq (%p832_p10)  ;;  %s1183_s10 = sld [smem:[#allocation4 + $0x21]] (%p832_p10) }
 0x678   :  { %1373 = vmatpush3.bf16.msra.mxu0 (%p832_p10), %v1187_v20  ;;  %v1192_v43 = vcombine.low (%p832_p10), %v1680_v36, %v1685_v37  ;;  %v1193_v44 = vcombine.low (%p832_p10), %v1690_v38, %v1695_v39  ;;  %v1194_v45 = vcombine.low (%p832_p10), %v1700_v40, %v1705_v41  ;;  %v842_v47 = vpack.c.bf16 (%p832_p10), %v841_v46, %v841_v46  ;;  %s1185_s11 = sld [smem:[#allocation4 + $0x23]] (%p832_p10)  ;;  %s1186_s12 = sld [smem:[#allocation4 + $0x24]] (%p832_p10) }
 0x679   :  { %1374 = vmatprep.subr.bf16.mxu0 (%p832_p10), %v1472_v21  ;;  %v935_v49 = vshrl.u32 (%p832_p10), %v934_v48, 7 }
 0x67b   :  { %v936_v50 = vsub.s32 (%p832_p10), 0, %v935_v49 }
 0x67c   :  { %1375 = vmatpush3.bf16.msra.mxu0 (%p832_p10), %v1188_v22  ;;  %v931_v51 = vstv (%p832_p10), %s1182_s8  ;;  %v941_v59 = vstv (%p832_p10), %s1184_s1 }
 0x67d   :  { %1376 = vmatprep.subr.bf16.mxu0 (%p832_p10), %v1472_v21  ;;  %v937_v52 = vrot.slane (%p832_p10), %v1710_v42, %v936_v50  ;;  %v944_v62 = vstv (%p832_p10), %s1183_s10 }
 0x67e   :  { %v946_v0 = vstv %s1185_s11  ;;  %v948_v1 = vstv %s1186_s12 }
 0x680   :  { %1377 = vmatpush3.bf16.msra.mxu0 %v1189_v23 }
 0x681   :  { %1378 = vmatprep.subr.bf16.mxu0 %v1472_v21 }
 0x684   :  { %1379 = vmatpush3.bf16.msra.mxu0 %v1190_v24 }
 0x685   :  { %1380 = vmatprep.subr.bf16.mxu0 %v1472_v21 }
 0x688   :  { %1381 = vmatpush3.bf16.msra.mxu0 %v1191_v25 }
 0x689   :  { %1382 = vmatprep.subr.bf16.mxu0 %v1472_v21 }
 0x68c   :  { %1383 = vmatpush3.bf16.msra.mxu0 %v1192_v43 }
 0x68d   :  { %1384 = vmatprep.subr.bf16.mxu0 %v1472_v21 }
 0x690   :  { %1385 = vmatpush3.bf16.msra.mxu0 %v1193_v44 }
 0x691   :  { %1386 = vmatprep.subr.bf16.mxu0 %v1472_v21 }
 0x694   :  { %1387 = vmatpush3.bf16.msra.mxu0 %v1194_v45 }
 0x697   :  { %1389 = vmatmul.mubr.bf16.vlgmr.msra.gmra.mrb[0].mxu0 %v842_v47 }
 0x76a   :  { %v925_v53 = vpop.f32.mrb[0].mxu0 }
 0x76b   :  { %v932_v54 = vmul.f32 %v931_v51, %v925_v53  ;;  %v1390_v55 = vpop.f32.mrb[1].mxu0 }
 0x76c   :  { %v928_v56 = vpop.f32.mrb[2].mxu0 }
 0x76d   :  { %v939_v57 = vadd.f32 %v937_v52, %v932_v54  ;;  %v1391_v58 = vpop.f32.mrb[3].mxu0 }
 0x76f   :  { %1439 = vtanh.f32 %v939_v57 }
 0x779   :  { %v1440_v60 = vpop.eup %1439 }
 0x77a   :  { %v942_v61 = vmul.f32 %v1440_v60, %v941_v59  ;;  %952 = vst [vmem:[#allocation3] sm:$0xf] %v1440_v60  ;;  %v949_v4 = vmul.f32 %v1440_v60, %v948_v1 }
 0x77c   :  { %v943_v63 = vsub.f32 %v841_v46, %v942_v61 }
 0x77e   :  { %v945_v42 = vmul.f32 %v944_v62, %v943_v63 }
 0x780   :  { %v947_v2 = vmul.f32 %v946_v0, %v945_v42 }
 0x782   :  { %v950_v5 = vadd.f32 %v949_v4, %v947_v2 }
 0x784   :  { %951 = vst [vmem:[#allocation2] sm:$0xf] %v950_v5 }
 0x785 PF:  { %1392 = vmatprep.subr.bf16.mxu0 %v1461_v26  ;;  %v1198_v6 = vcombine.low %v1630_v27, %v1635_v28  ;;  %v1199_v7 = vcombine.low %v1640_v3, %v1645_v29  ;;  %vm1474_vm7 = vmmov 0   ;;  %v1200_v8 = vcombine.low %v1650_v30, %v1655_v31  ;;  %s1195_s13 = sld [smem:[#allocation4 + $0x26]]  ;;  %s1197_s0 = sld [smem:[#allocation4 + $0x28]]  ;;  %v1070_v14 = vld [vmem:[#allocation3] sm:$0xf] }
 0x786   :  { %1408 = vmatprep.mubr.msk.bf16.mxu0 %vm1474_vm7, %v1461_v26  ;;  %v1201_v9 = vcombine.low %v1660_v32, %v1665_v33  ;;  %v1202_v27 = vcombine.low %v1670_v34, %v1675_v35  ;;  %v1203_v28 = vcombine.low %v1680_v36, %v1685_v37  ;;  %v1204_v3 = vcombine.low %v1690_v38, %v1695_v39  ;;  %v1206_v34 = vld [vmem:[%s1860_s6] ss:$0 sm:$0xff]  ;;  %s1196_s18 = sld [smem:[#allocation4 + $0x27]] }
 0x787   :  { %1393 = vmatpush3.bf16.msra.mxu0 %v1198_v6  ;;  %v1205_v29 = vcombine.low %v1700_v40, %v1705_v41  ;;  %v1207_v35 = vld [vmem:[%s1861_s7] ss:$0 sm:$0xff] }
 0x788   :  { %1394 = vmatprep.subr.bf16.mxu0 %v1461_v26 }
 0x78b   :  { %1395 = vmatpush3.bf16.msra.mxu0 %v1199_v7  ;;  %v956_v30 = vld [vmem:[#allocation2] sm:$0xf]  ;;  %v1046_v32 = vstv %s1195_s13  ;;  %v1067_v11 = vstv %s1197_s0 }
 0x78c   :  { %1396 = vmatprep.subr.bf16.mxu0 %v1461_v26  ;;  %v957_v31 = vpack.c.bf16 %v956_v30, %v956_v30  ;;  %v1072_v16 = vstv %s1196_s18 }
 0x78f   :  { %1397 = vmatpush3.bf16.msra.mxu0 %v1200_v8 }
 0x790   :  { %1398 = vmatprep.subr.bf16.mxu0 %v1461_v26 }
 0x793   :  { %1399 = vmatpush3.bf16.msra.mxu0 %v1201_v9 }
 0x794   :  { %1400 = vmatprep.subr.bf16.mxu0 %v1461_v26 }
 0x797   :  { %1401 = vmatpush3.bf16.msra.mxu0 %v1202_v27 }
 0x798   :  { %1402 = vmatprep.subr.bf16.mxu0 %v1461_v26 }
 0x79b   :  { %1403 = vmatpush3.bf16.msra.mxu0 %v1203_v28 }
 0x79c   :  { %1404 = vmatprep.subr.bf16.mxu0 %v1461_v26 }
 0x79f   :  { %1405 = vmatpush3.bf16.msra.mxu0 %v1204_v3 }
 0x7a0   :  { %1406 = vmatprep.subr.bf16.mxu0 %v1461_v26 }
 0x7a3   :  { %1407 = vmatpush3.bf16.msra.mxu0 %v1205_v29 }
 0x7a6   :  { %1409 = vmatmul.mubr.bf16.vlgmr.msra.gmra.mrb[0].mxu0 %v957_v31 }
 0x879   :  { %v1040_v33 = vpop.f32.mrb[0].mxu0 }
 0x87a   :  { %v1047_v36 = vmul.f32 %v1046_v32, %v1040_v33  ;;  %v1410_v37 = vpop.f32.mrb[1].mxu0 }
 0x87b   :  { %v1043_v38 = vpop.f32.mrb[2].mxu0 }
 0x87c   :  { %v1055_v39 = vadd.f32 %v1206_v34, %v1047_v36  ;;  %v1064_v40 = vadd.f32 %v1207_v35, %v1047_v36  ;;  %v1411_v26 = vpop.f32.mrb[3].mxu0 }
 0x87e   :  { %1441 = vtanh.f32 %v1055_v39 }
 0x87f   :  { %1443 = vtanh.f32 %v1064_v40 }
 0x888   :  { %v1442_v41 = vpop.eup %1441 }
 0x889   :  { %v1444_v10 = vpop.eup %1443 }
 0x88a   :  { %v1066_v12 = vsub.f32 %v1444_v10, %v1442_v41 }
 0x88c   :  { %v1068_v13 = vmul.f32 %v1067_v11, %v1066_v12 }
 0x88e   :  { %v1069_v15 = vadd.f32 %v1442_v41, %v1068_v13 }
 0x890   :  { %v1071_v17 = vsub.f32 %v1069_v15, %v1070_v14 }
 0x892   :  { %v1073_v18 = vmul.f32 %v1072_v16, %v1071_v17 }
 0x894   :  { %vm1074_vm8 = vcmp.ne.f32.partialorder %v1073_v18, %v1073_v18 }
 0x895   :  { %v1075_v19 = vsel %vm1074_vm8, 0.0, %v1073_v18 }
 0x896   :  { %v1208_v20 = vclamps-f32 %v1075_v19, 3.4028235e+38 }
 0x898   :  { %1078 = vst [vmem:[%s1863_s9] sm:$0xf] %v1208_v20 }
 0x899   :  { %1083 = vsyncpa [#allocation5], 1 }

</bundles_post_ra>
